<compile_context>
chip_gen: v7x
topology: tpu7x:2x2x1
jax: 0.10.0
libtpu: 0.0.40
codegen_flags: <defaults>
</compile_context>

<pallas_src>
import functools

import jax
import jax.numpy as jnp
from jax import lax
from jax.experimental import pallas as pl
from jax.experimental.pallas import tpu as pltpu


# ----------------------------------------------------------------------------
# Fully fused SAtt kernel: one batch element per grid step.
# ----------------------------------------------------------------------------
def _satt_fused_kernel(xp_ref, w_qkv_ref, b_qkv_ref, w_out_ref, b_out_ref,
                       o_ref, ctx_pad_ref, *, H, W, C):
    # xp_ref:      (1, H+2, W+2, C)  zero-padded input tile
    # w_qkv_ref:   (9C, 3C)          stacked folded Q/K/V im2col weights
    # b_qkv_ref:   (1, 3C)           stacked folded Q/K/V biases
    # w_out_ref:   (9C, C)           folded output-conv im2col weight
    # b_out_ref:   (1, C)            folded output-conv bias
    # o_ref:       (1, H, W, C)
    # ctx_pad_ref: (H+2, W+2, C)     VMEM scratch for the padded context
    HW = H * W

    def im2col(x_pad):
        # x_pad: (H+2, W+2, C) -> (HW, 9C); column order is tap-major,
        # cin-minor, matching the weight layout built in _init_conv_bn.
        cols = [x_pad[ky:ky + H, kx:kx + W, :]
                for ky in range(3) for kx in range(3)]
        return jnp.concatenate(cols, axis=-1).reshape(HW, 9 * C)

    # ---- fused Q/K/V conv (+folded BN, ReLU): one im2col matmul ------------
    patches = im2col(xp_ref[0])                                     # (HW, 9C)
    qkv = jnp.dot(patches, w_qkv_ref[...],
                  preferred_element_type=jnp.float32)               # (HW, 3C)
    qkv = jnp.maximum(qkv + b_qkv_ref[...], 0.0)
    q = qkv[:, 0 * C:1 * C]
    k = qkv[:, 1 * C:2 * C]
    v = qkv[:, 2 * C:3 * C]

    # ---- attention: softmax(q k^T) v  (no transpose materialized) ----------
    s = lax.dot_general(q, k, (((1,), (1,)), ((), ())),
                        preferred_element_type=jnp.float32)         # (HW, HW)
    s = s - jnp.max(s, axis=-1, keepdims=True)
    p = jnp.exp(s)
    p = p * pl.reciprocal(jnp.sum(p, axis=-1, keepdims=True), approx=True)
    ctx = jnp.dot(p, v, preferred_element_type=jnp.float32)         # (HW, C)

    # ---- zero-pad context in VMEM scratch, then output conv ----------------
    ctx_pad_ref[...] = jnp.zeros_like(ctx_pad_ref)
    ctx_pad_ref[pl.ds(1, H), pl.ds(1, W), :] = ctx.reshape(H, W, C)
    patches2 = im2col(ctx_pad_ref[...])                             # (HW, 9C)
    out = jnp.dot(patches2, w_out_ref[...],
                  preferred_element_type=jnp.float32)               # (HW, C)
    out = jnp.maximum(out + b_out_ref[...], 0.0)
    o_ref[0] = out.reshape(H, W, C).astype(o_ref.dtype)


def satt_forward(x_nchw, params):
    """SAtt forward: (B, C, H, W) float32 -> (B, C, H, W)."""
    x = jnp.transpose(x_nchw, (0, 2, 3, 1)).astype(jnp.float32)     # NHWC
    B, H, W, C = x.shape
    xp = jnp.pad(x, ((0, 0), (1, 1), (1, 1), (0, 0)))               # pad once

    kernel = functools.partial(_satt_fused_kernel, H=H, W=W, C=C)
    out_nhwc = pl.pallas_call(
        kernel,
        out_shape=jax.ShapeDtypeStruct((B, H, W, C), jnp.float32),
        grid=(B,),
        in_specs=[
            pl.BlockSpec((1, H + 2, W + 2, C), lambda b: (b, 0, 0, 0)),
            # Grid-invariant weights/bias: constant index_map keeps them
            # resident across grid steps.
            pl.BlockSpec((9 * C, 3 * C), lambda b: (0, 0)),
            pl.BlockSpec((1, 3 * C), lambda b: (0, 0)),
            pl.BlockSpec((9 * C, C), lambda b: (0, 0)),
            pl.BlockSpec((1, C), lambda b: (0, 0)),
        ],
        out_specs=pl.BlockSpec((1, H, W, C), lambda b: (b, 0, 0, 0)),
        scratch_shapes=[pltpu.VMEM((H + 2, W + 2, C), jnp.float32)],
        compiler_params=pltpu.CompilerParams(
            dimension_semantics=("parallel",)),
    )(xp, params["w_qkv"], params["b_qkv"], params["w_out"], params["b_out"])

    return jnp.transpose(out_nhwc, (0, 3, 1, 2))                    # back to NCHW


# ----------------------------------------------------------------------------
# Parameter construction (deterministic): Conv2d + folded BatchNorm.
# ----------------------------------------------------------------------------
def _init_conv_bn(key, C, eps=1e-5):
    """Conv2d(C,C,3,pad=1)+BN(C) folded to im2col weight (9C, C) + bias (C,)."""
    k1, k2, k3, k4, k5, k6 = jax.random.split(key, 6)
    w = jax.random.normal(k1, (C, C, 3, 3), jnp.float32) * 0.05   # (Cout,Cin,kh,kw)
    conv_b = jax.random.normal(k2, (C,), jnp.float32) * 0.05
    gamma = 1.0 + 0.1 * jax.random.normal(k3, (C,), jnp.float32)
    beta = 0.1 * jax.random.normal(k4, (C,), jnp.float32)
    mean = 0.1 * jax.random.normal(k5, (C,), jnp.float32)
    var = 1.0 + 0.1 * jnp.abs(jax.random.normal(k6, (C,), jnp.float32))
    scale = gamma / jnp.sqrt(var + eps)
    w_f = w * scale[:, None, None, None]
    b_f = (conv_b - mean) * scale + beta
    # (Cout,Cin,kh,kw) -> (kh,kw,Cin,Cout) -> (9*Cin, Cout): rows ordered
    # tap-major, cin-minor to match the kernel's im2col column order.
    w_im2col = jnp.transpose(w_f, (2, 3, 1, 0)).reshape(9 * C, C)
    return w_im2col, b_f


def init_satt_params(key, C):
    kq, kk, kv, ko = jax.random.split(key, 4)
    wq, bq = _init_conv_bn(kq, C)
    wk, bk = _init_conv_bn(kk, C)
    wv, bv = _init_conv_bn(kv, C)
    wo, bo = _init_conv_bn(ko, C)
    return {
        "w_qkv": jnp.concatenate([wq, wk, wv], axis=1),      # (9C, 3C)
        "b_qkv": jnp.concatenate([bq, bk, bv])[None, :],     # (1, 3C)
        "w_out": wo,                                         # (9C, C)
        "b_out": bo[None, :],                                # (1, C)
    }


if __name__ == "__main__":
    key = jax.random.PRNGKey(0)
    kx, kp = jax.random.split(key)

    B, C, H, W = 2, 32, 8, 8          # small shapes consistent with SAtt(channel=C)
    x = jax.random.normal(kx, (B, C, H, W), jnp.float32)
    params = init_satt_params(kp, C)

    fwd = jax.jit(satt_forward)
    out = fwd(x, params)
    jax.block_until_ready(out)
    assert out.shape == (B, C, H, W)
    print("KERNEL_OK")
</pallas_src>

<mosaic_0001>
module attributes {stable_mosaic.version = 11 : i64} {
  func.func @_satt_fused_kernel(%arg0: i32, %arg1: memref<1x10x10x32xf32, #tpu.memory_space<vmem>>, %arg2: memref<288x96xf32, #tpu.memory_space<vmem>>, %arg3: memref<1x96xf32, #tpu.memory_space<vmem>>, %arg4: memref<288x32xf32, #tpu.memory_space<vmem>>, %arg5: memref<1x32xf32, #tpu.memory_space<vmem>>, %arg6: memref<1x8x8x32xf32, #tpu.memory_space<vmem>>, %arg7: memref<10x10x32xf32, #tpu.memory_space<vmem>>) attributes {dimension_semantics = [#tpu.dimension_semantics<parallel>], iteration_bounds = array<i64: 2>, scalar_prefetch = 0 : i64, scratch_operands = 1 : i64, tpu.core_type = #tpu.core_type<tc>, window_params = [{transform_indices = @transform_0, window_bounds = array<i64: 1, 10, 10, 32>}, {pipeline_mode = #tpu.pipeline_mode<synchronous>, transform_indices = @transform_1, window_bounds = array<i64: 288, 96>}, {pipeline_mode = #tpu.pipeline_mode<synchronous>, transform_indices = @transform_2, window_bounds = array<i64: 1, 96>}, {pipeline_mode = #tpu.pipeline_mode<synchronous>, transform_indices = @transform_3, window_bounds = array<i64: 288, 32>}, {pipeline_mode = #tpu.pipeline_mode<synchronous>, transform_indices = @transform_4, window_bounds = array<i64: 1, 32>}, {transform_indices = @transform_5, window_bounds = array<i64: 1, 8, 8, 32>}]} {
    %c0 = arith.constant 0 : index
    %c0_0 = arith.constant 0 : index
    %c0_1 = arith.constant 0 : index
    %c0_2 = arith.constant 0 : index
    %0 = vector.load %arg1[%c0, %c0_0, %c0_1, %c0_2] : memref<1x10x10x32xf32, #tpu.memory_space<vmem>>, vector<1x10x10x32xf32>
    %1 = vector.shape_cast %0 : vector<1x10x10x32xf32> to vector<10x10x32xf32>
    %2 = vector.extract_strided_slice %1 {offsets = [0, 0, 0], sizes = [8, 8, 32], strides = [1, 1, 1]} : vector<10x10x32xf32> to vector<8x8x32xf32>
    %3 = vector.extract_strided_slice %1 {offsets = [0, 1, 0], sizes = [8, 8, 32], strides = [1, 1, 1]} : vector<10x10x32xf32> to vector<8x8x32xf32>
    %4 = vector.extract_strided_slice %1 {offsets = [0, 2, 0], sizes = [8, 8, 32], strides = [1, 1, 1]} : vector<10x10x32xf32> to vector<8x8x32xf32>
    %5 = vector.extract_strided_slice %1 {offsets = [1, 0, 0], sizes = [8, 8, 32], strides = [1, 1, 1]} : vector<10x10x32xf32> to vector<8x8x32xf32>
    %6 = vector.extract_strided_slice %1 {offsets = [1, 1, 0], sizes = [8, 8, 32], strides = [1, 1, 1]} : vector<10x10x32xf32> to vector<8x8x32xf32>
    %7 = vector.extract_strided_slice %1 {offsets = [1, 2, 0], sizes = [8, 8, 32], strides = [1, 1, 1]} : vector<10x10x32xf32> to vector<8x8x32xf32>
    %8 = vector.extract_strided_slice %1 {offsets = [2, 0, 0], sizes = [8, 8, 32], strides = [1, 1, 1]} : vector<10x10x32xf32> to vector<8x8x32xf32>
    %9 = vector.extract_strided_slice %1 {offsets = [2, 1, 0], sizes = [8, 8, 32], strides = [1, 1, 1]} : vector<10x10x32xf32> to vector<8x8x32xf32>
    %10 = vector.extract_strided_slice %1 {offsets = [2, 2, 0], sizes = [8, 8, 32], strides = [1, 1, 1]} : vector<10x10x32xf32> to vector<8x8x32xf32>
    %11 = tpu.concatenate %2, %3, %4, %5, %6, %7, %8, %9, %10 in 2 : vector<8x8x32xf32>, vector<8x8x32xf32>, vector<8x8x32xf32>, vector<8x8x32xf32>, vector<8x8x32xf32>, vector<8x8x32xf32>, vector<8x8x32xf32>, vector<8x8x32xf32>, vector<8x8x32xf32> -> vector<8x8x288xf32>
    %12 = vector.shape_cast %11 : vector<8x8x288xf32> to vector<64x288xf32>
    %c0_3 = arith.constant 0 : index
    %c0_4 = arith.constant 0 : index
    %13 = vector.load %arg2[%c0_3, %c0_4] : memref<288x96xf32, #tpu.memory_space<vmem>>, vector<288x96xf32>
    %cst = arith.constant dense<0.000000e+00> : vector<64x96xf32>
    %14 = tpu.matmul %12, %13, %cst {dimension_numbers = #tpu.dot_dimension_numbers<[1], [0], [0], [1], [0, 0, 1, 1], [], []>} : vector<64x288xf32>, vector<288x96xf32>, vector<64x96xf32> -> vector<64x96xf32>
    %c0_5 = arith.constant 0 : index
    %c0_6 = arith.constant 0 : index
    %15 = vector.load %arg3[%c0_5, %c0_6] : memref<1x96xf32, #tpu.memory_space<vmem>>, vector<1x96xf32>
    %16 = vector.broadcast %15 : vector<1x96xf32> to vector<64x96xf32>
    %17 = arith.addf %14, %16 : vector<64x96xf32>
    %cst_7 = arith.constant 0.000000e+00 : f32
    %18 = vector.broadcast %cst_7 : f32 to vector<64x96xf32>
    %19 = arith.maximumf %17, %18 : vector<64x96xf32>
    %20 = vector.extract_strided_slice %19 {offsets = [0, 0], sizes = [64, 32], strides = [1, 1]} : vector<64x96xf32> to vector<64x32xf32>
    %21 = vector.extract_strided_slice %19 {offsets = [0, 32], sizes = [64, 32], strides = [1, 1]} : vector<64x96xf32> to vector<64x32xf32>
    %22 = vector.extract_strided_slice %19 {offsets = [0, 64], sizes = [64, 32], strides = [1, 1]} : vector<64x96xf32> to vector<64x32xf32>
    %cst_8 = arith.constant dense<0.000000e+00> : vector<64x64xf32>
    %23 = tpu.matmul %20, %21, %cst_8 {dimension_numbers = #tpu.dot_dimension_numbers<[1], [1], [0], [0], [0, 0, 1, 0], [], []>} : vector<64x32xf32>, vector<64x32xf32>, vector<64x64xf32> -> vector<64x64xf32>
    %cst_9 = arith.constant dense<0xFF800000> : vector<64xf32>
    %24 = vector.multi_reduction <maximumf>, %23, %cst_9 [1] : vector<64x64xf32> to vector<64xf32>
    %25 = vector.shape_cast %24 : vector<64xf32> to vector<64x1xf32>
    %26 = vector.broadcast %25 : vector<64x1xf32> to vector<64x64xf32>
    %27 = arith.subf %23, %26 : vector<64x64xf32>
    %28 = math.exp %27 : vector<64x64xf32>
    %cst_10 = arith.constant dense<0.000000e+00> : vector<64xf32>
    %29 = vector.multi_reduction <add>, %28, %cst_10 [1] : vector<64x64xf32> to vector<64xf32>
    %30 = vector.shape_cast %29 : vector<64xf32> to vector<64x1xf32>
    %31 = tpu.reciprocal %30 {approx = true} : vector<64x1xf32> -> vector<64x1xf32>
    %32 = vector.broadcast %31 : vector<64x1xf32> to vector<64x64xf32>
    %33 = arith.mulf %28, %32 : vector<64x64xf32>
    %cst_11 = arith.constant dense<0.000000e+00> : vector<64x32xf32>
    %34 = tpu.matmul %33, %22, %cst_11 {dimension_numbers = #tpu.dot_dimension_numbers<[1], [0], [0], [1], [0, 0, 1, 1], [], []>} : vector<64x64xf32>, vector<64x32xf32>, vector<64x32xf32> -> vector<64x32xf32>
    %cst_12 = arith.constant 0.000000e+00 : f32
    %35 = vector.broadcast %cst_12 : f32 to vector<10x10x32xf32>
    %c0_13 = arith.constant 0 : index
    %c0_14 = arith.constant 0 : index
    %c0_15 = arith.constant 0 : index
    %36 = vector.load %arg7[%c0_13, %c0_14, %c0_15] : memref<10x10x32xf32, #tpu.memory_space<vmem>>, vector<10x10x32xf32>
    tpu.vector_store %arg7[%c0_13, %c0_14, %c0_15], %35 {strides = array<i32>} : memref<10x10x32xf32, #tpu.memory_space<vmem>>, vector<10x10x32xf32>,
    %37 = vector.shape_cast %34 : vector<64x32xf32> to vector<8x8x32xf32>
    %c1 = arith.constant 1 : index
    %c1_16 = arith.constant 1 : index
    %c0_17 = arith.constant 0 : index
    %38 = vector.load %arg7[%c1, %c1_16, %c0_17] : memref<10x10x32xf32, #tpu.memory_space<vmem>>, vector<8x8x32xf32>
    tpu.vector_store %arg7[%c1, %c1_16, %c0_17], %37 {strides = array<i32>} : memref<10x10x32xf32, #tpu.memory_space<vmem>>, vector<8x8x32xf32>,
    %c0_18 = arith.constant 0 : index
    %c0_19 = arith.constant 0 : index
    %c0_20 = arith.constant 0 : index
    %39 = vector.load %arg7[%c0_18, %c0_19, %c0_20] : memref<10x10x32xf32, #tpu.memory_space<vmem>>, vector<10x10x32xf32>
    %40 = vector.extract_strided_slice %39 {offsets = [0, 0, 0], sizes = [8, 8, 32], strides = [1, 1, 1]} : vector<10x10x32xf32> to vector<8x8x32xf32>
    %41 = vector.extract_strided_slice %39 {offsets = [0, 1, 0], sizes = [8, 8, 32], strides = [1, 1, 1]} : vector<10x10x32xf32> to vector<8x8x32xf32>
    %42 = vector.extract_strided_slice %39 {offsets = [0, 2, 0], sizes = [8, 8, 32], strides = [1, 1, 1]} : vector<10x10x32xf32> to vector<8x8x32xf32>
    %43 = vector.extract_strided_slice %39 {offsets = [1, 0, 0], sizes = [8, 8, 32], strides = [1, 1, 1]} : vector<10x10x32xf32> to vector<8x8x32xf32>
    %44 = vector.extract_strided_slice %39 {offsets = [1, 1, 0], sizes = [8, 8, 32], strides = [1, 1, 1]} : vector<10x10x32xf32> to vector<8x8x32xf32>
    %45 = vector.extract_strided_slice %39 {offsets = [1, 2, 0], sizes = [8, 8, 32], strides = [1, 1, 1]} : vector<10x10x32xf32> to vector<8x8x32xf32>
    %46 = vector.extract_strided_slice %39 {offsets = [2, 0, 0], sizes = [8, 8, 32], strides = [1, 1, 1]} : vector<10x10x32xf32> to vector<8x8x32xf32>
    %47 = vector.extract_strided_slice %39 {offsets = [2, 1, 0], sizes = [8, 8, 32], strides = [1, 1, 1]} : vector<10x10x32xf32> to vector<8x8x32xf32>
    %48 = vector.extract_strided_slice %39 {offsets = [2, 2, 0], sizes = [8, 8, 32], strides = [1, 1, 1]} : vector<10x10x32xf32> to vector<8x8x32xf32>
    %49 = tpu.concatenate %40, %41, %42, %43, %44, %45, %46, %47, %48 in 2 : vector<8x8x32xf32>, vector<8x8x32xf32>, vector<8x8x32xf32>, vector<8x8x32xf32>, vector<8x8x32xf32>, vector<8x8x32xf32>, vector<8x8x32xf32>, vector<8x8x32xf32>, vector<8x8x32xf32> -> vector<8x8x288xf32>
    %50 = vector.shape_cast %49 : vector<8x8x288xf32> to vector<64x288xf32>
    %c0_21 = arith.constant 0 : index
    %c0_22 = arith.constant 0 : index
    %51 = vector.load %arg4[%c0_21, %c0_22] : memref<288x32xf32, #tpu.memory_space<vmem>>, vector<288x32xf32>
    %cst_23 = arith.constant dense<0.000000e+00> : vector<64x32xf32>
    %52 = tpu.matmul %50, %51, %cst_23 {dimension_numbers = #tpu.dot_dimension_numbers<[1], [0], [0], [1], [0, 0, 1, 1], [], []>} : vector<64x288xf32>, vector<288x32xf32>, vector<64x32xf32> -> vector<64x32xf32>
    %c0_24 = arith.constant 0 : index
    %c0_25 = arith.constant 0 : index
    %53 = vector.load %arg5[%c0_24, %c0_25] : memref<1x32xf32, #tpu.memory_space<vmem>>, vector<1x32xf32>
    %54 = vector.broadcast %53 : vector<1x32xf32> to vector<64x32xf32>
    %55 = arith.addf %52, %54 : vector<64x32xf32>
    %cst_26 = arith.constant 0.000000e+00 : f32
    %56 = vector.broadcast %cst_26 : f32 to vector<64x32xf32>
    %57 = arith.maximumf %55, %56 : vector<64x32xf32>
    %58 = vector.shape_cast %57 : vector<64x32xf32> to vector<8x8x32xf32>
    %c0_27 = arith.constant 0 : index
    %c0_28 = arith.constant 0 : index
    %c0_29 = arith.constant 0 : index
    %c0_30 = arith.constant 0 : index
    %59 = vector.load %arg6[%c0_27, %c0_28, %c0_29, %c0_30] : memref<1x8x8x32xf32, #tpu.memory_space<vmem>>, vector<1x8x8x32xf32>
    %60 = vector.shape_cast %59 : vector<1x8x8x32xf32> to vector<8x8x32xf32>
    %61 = vector.shape_cast %58 : vector<8x8x32xf32> to vector<1x8x8x32xf32>
    tpu.vector_store %arg6[%c0_27, %c0_28, %c0_29, %c0_30], %61 {strides = array<i32>} : memref<1x8x8x32xf32, #tpu.memory_space<vmem>>, vector<1x8x8x32xf32>,
    return
  }
  func.func @transform_0(%arg0: i32) -> (i32, i32, i32, i32) {
    %c0_i32 = arith.constant 0 : i32
    %c0_i32_0 = arith.constant 0 : i32
    %c0_i32_1 = arith.constant 0 : i32
    %c0_i32_2 = arith.constant 0 : i32
    return %arg0, %c0_i32, %c0_i32_0, %c0_i32_1 : i32, i32, i32, i32
  }
  func.func @transform_1(%arg0: i32) -> (i32, i32) {
    %c0_i32 = arith.constant 0 : i32
    %c0_i32_0 = arith.constant 0 : i32
    %c0_i32_1 = arith.constant 0 : i32
    return %c0_i32, %c0_i32_0 : i32, i32
  }
  func.func @transform_2(%arg0: i32) -> (i32, i32) {
    %c0_i32 = arith.constant 0 : i32
    %c0_i32_0 = arith.constant 0 : i32
    %c0_i32_1 = arith.constant 0 : i32
    return %c0_i32, %c0_i32_0 : i32, i32
  }
  func.func @transform_3(%arg0: i32) -> (i32, i32) {
    %c0_i32 = arith.constant 0 : i32
    %c0_i32_0 = arith.constant 0 : i32
    %c0_i32_1 = arith.constant 0 : i32
    return %c0_i32, %c0_i32_0 : i32, i32
  }
  func.func @transform_4(%arg0: i32) -> (i32, i32) {
    %c0_i32 = arith.constant 0 : i32
    %c0_i32_0 = arith.constant 0 : i32
    %c0_i32_1 = arith.constant 0 : i32
    return %c0_i32, %c0_i32_0 : i32, i32
  }
  func.func @transform_5(%arg0: i32) -> (i32, i32, i32, i32) {
    %c0_i32 = arith.constant 0 : i32
    %c0_i32_0 = arith.constant 0 : i32
    %c0_i32_1 = arith.constant 0 : i32
    %c0_i32_2 = arith.constant 0 : i32
    return %arg0, %c0_i32, %c0_i32_0, %c0_i32_1 : i32, i32, i32, i32
  }
}

</mosaic_0001>

<bundles_post_ra>
// kernel: satt_forward.1
= control target key start
LH: loop header
LB: loop body
LE: loop exit
PB: predicated region body
PF: predicated region fallthrough
CT: control target
= control target key end

     0   :  { %10 = vsyncpa [#allocation4], 0  ;;  %s3689_s0 = inlined_call_operand.vmem [shape: f32[2,10,10,32], index: 0, kind: input, shape index: {}]   ;;  %s3690_s1 = inlined_call_operand.vmem [shape: f32[288,96], index: 1, kind: input, shape index: {}]   ;;  %s3691_s2 = inlined_call_operand.vmem [shape: f32[1,96], index: 2, kind: input, shape index: {}]   ;;  %s3692_s3 = inlined_call_operand.vmem [shape: f32[288,32], index: 3, kind: input, shape index: {}]   ;;  %s3693_s4 = inlined_call_operand.vmem [shape: f32[1,32], index: 4, kind: input, shape index: {}]   ;;  %s3694_s5 = inlined_call_operand.hbm [shape: f32[2,8,8,32], index: 5, kind: output, shape index: {}]  }
   0x1   :  { %12 = vsyncpa [#allocation4 + $0x1], 0  ;;  %s2795_s18 = smov 0   ;;  %s2797_s19 = smov 0  }
   0x2   :  { %s2799_s20 = smov 0   ;;  %s2801_s21 = smov 0  }
   0x3 LB: > { %s2816_s22 = sadd.s32 4294967295, %s2756_s21   ;;  %s1898_s23 = sadd.s32 4294967294, %s2756_s21   ;;  %s2756_s21 = sphi %s2801_s21, %s3702_s21   ;;  %s2752_s20 = sphi %s2799_s20, %s3701_s20   ;;  %s2748_s19 = sphi %s2797_s19, %s3700_s19   ;;  %s2744_s18 = sphi %s2795_s18, %s3699_s18  }
   0x4   : > { %s2820_s24 = sadd.s32 1, %s2756_s21   ;;  %s135_s25 = sadd.s32 1, %s2752_s20 }
   0x5   : > { %s132_s26 = ssub.s32 %s2756_s21, %s2820_s24  ;;  %p145_p0 = scmp.ne.s32.totalorder %s2752_s20, %s2748_s19 }
   0x6   : > { %p133_p1 = scmp.eq.s32.totalorder %s132_s26, 0  ;;  %p146_p2 = scmp.eq.s32.totalorder %s2816_s22, 1 }
   0x7   : > { %p151_p3 = scmp.ne.s32.totalorder %s2748_s19, %s2744_s18  ;;  %p152_p4 = scmp.eq.s32.totalorder %s1898_s23, 1 }
   0x8   : > { %s2831_s27 = scalar_select %p133_p1, %s2752_s20, %s135_s25  }
   0x9   : > { %p2833_p5 = por %p146_p2, %p145_p0  ;;  %p2837_p6 = por %p152_p4, %p151_p3 }
   0xa   : > { %p1901_p7 = scmp.ge.s32.totalorder %s2756_s21, 1  ;;  %p190_p8 = scmp.lt.s32.totalorder %s2756_s21, 3 }
   0xc   : > { %p191_p9 = pnand %p1901_p7, %p190_p8 }
   0xd   : > { %p218_p10 = scmp.lt.s32.totalorder (!%p191_p9), %s2816_s22, 1  ;;  %v544_v0 = vld [vmem:[%s3690_s1 + $0x80] sm:$0xff] (!%p191_p9)  ;;  %v545_v1 = vld [vmem:[%s3690_s1 + $0x88] sm:$0xff] (!%p191_p9)  ;;  %v546_v5 = vld [vmem:[%s3690_s1 + $0x90] sm:$0xff] (!%p191_p9)  ;;  %vm259_vm0 = vcmask (!%p191_p9), 1046528   ;;  %vm308_vm1 = vcmask (!%p191_p9), 1045504  }
   0xe   : > { %194 = sbr.rel (%p191_p9) target bundleno = 1731 (0x6c3), region = 40  ;;  %v2216_v2 = vpack.c.bf16 (!%p191_p9), %v545_v1, %v544_v0  ;;  %v528_v3 = vld [vmem:[%s3690_s1] sm:$0xff] (!%p191_p9)  ;;  %v529_v4 = vld [vmem:[%s3690_s1 + $0x8] sm:$0xff] (!%p191_p9)  ;;  %v547_v7 = vld [vmem:[%s3690_s1 + $0x98] sm:$0xff] (!%p191_p9)  ;;  %s2758_s25 = smov (!%p191_p9), 32   ;;  %vm477_vm2 = vcmask (!%p191_p9), 261120  }
   0xf   : > { %v2218_v6 = vpack.c.bf16 (!%p191_p9), %v529_v4, %v528_v3  ;;  %v530_v8 = vld [vmem:[%s3690_s1 + $0x10] sm:$0xff] (!%p191_p9)  ;;  %v531_v9 = vld [vmem:[%s3690_s1 + $0x18] sm:$0xff] (!%p191_p9)  ;;  %v2220_v10 = vpack.c.bf16 (!%p191_p9), %v547_v7, %v546_v5  ;;  %v548_v11 = vld [vmem:[%s3690_s1 + $0xa0] sm:$0xff] (!%p191_p9)  ;;  %s2760_s26 = smov (!%p191_p9), 64   ;;  %vm486_vm3 = vcmask (!%p191_p9), 523264   ;;  %vm495_vm4 = vcmask (!%p191_p9), 785408  }
  0x10   : > { %2217 = vmatprep.subr.bf16.mxu0 (!%p191_p9), %v2216_v2  ;;  %v549_v12 = vld [vmem:[%s3690_s1 + $0xa8] sm:$0xff] (!%p191_p9)  ;;  %v2222_v13 = vpack.c.bf16 (!%p191_p9), %v531_v9, %v530_v8  ;;  %v532_v14 = vld [vmem:[%s3690_s1 + $0x20] sm:$0xff] (!%p191_p9)  ;;  %v550_v17 = vld [vmem:[%s3690_s1 + $0xb0] sm:$0xff] (!%p191_p9)  ;;  %vm1208_vm6 = vcmask (!%p191_p9), 254976   ;;  %s1951_s13 = sshll.u32 (!%p191_p9), %s2816_s22, 10  ;;  %s2762_s23 = smov (!%p191_p9), [#allocation3]  }
  0x11   : > { %2219 = vmatpush3.bf16.msra.mxu0 (!%p191_p9), %v2218_v6  ;;  %v533_v15 = vld [vmem:[%s3690_s1 + $0x28] sm:$0xff] (!%p191_p9)  ;;  %v2224_v16 = vpack.c.bf16 (!%p191_p9), %v549_v12, %v548_v11  ;;  %v551_v18 = vld [vmem:[%s3690_s1 + $0xb8] sm:$0xff] (!%p191_p9)  ;;  %v534_v19 = vld [vmem:[%s3690_s1 + $0x30] sm:$0xff] (!%p191_p9)  ;;  %s3640_s16 = scalar_lea.hbm (!%p191_p9), %s3694_s5, %s1951_s13  ;;  %s2698_s30 = sshll.u32 (!%p191_p9), %s2762_s23, 4  ;;  %s2699_s30 = int_to_ptr.vmem [resolvable:$false] %s2698_s30 }
  0x12   : > { %2221 = vmatprep.subr.bf16.mxu0 (!%p191_p9), %v2220_v10  ;;  %v535_v20 = vld [vmem:[%s3690_s1 + $0x38] sm:$0xff] (!%p191_p9)  ;;  %v552_v21 = vld [vmem:[%s3690_s1 + $0xc0] sm:$0xff] (!%p191_p9)  ;;  %v553_v22 = vld [vmem:[%s3690_s1 + $0xc8] sm:$0xff] (!%p191_p9)  ;;  %v2226_v26 = vpack.c.bf16 (!%p191_p9), %v533_v15, %v532_v14  ;;  %v2228_v32 = vpack.c.bf16 (!%p191_p9), %v551_v18, %v550_v17  ;;  %s2700_s6 = scalar_lea.vmem (!%p191_p9), %s2699_s30, 2048 }
  0x13   : > { %v2230_v38 = vpack.c.bf16 (!%p191_p9), %v535_v20, %v534_v19  ;;  %v2232_v47 = vpack.c.bf16 (!%p191_p9), %v553_v22, %v552_v21  ;;  %v536_v56 = vld [vmem:[%s3690_s1 + $0x40] sm:$0xff] (!%p191_p9)  ;;  %v537_v57 = vld [vmem:[%s3690_s1 + $0x48] sm:$0xff] (!%p191_p9)  ;;  %v554_v18 = vld [vmem:[%s3690_s1 + $0xd0] sm:$0xff] (!%p191_p9) }
  0x14   : > { %v2234_v2 = vpack.c.bf16 (!%p191_p9), %v537_v57, %v536_v56  ;;  %v555_v19 = vld [vmem:[%s3690_s1 + $0xd8] sm:$0xff] (!%p191_p9)  ;;  %v538_v20 = vld [vmem:[%s3690_s1 + $0x50] sm:$0xff] (!%p191_p9)  ;;  %v556_v22 = vld [vmem:[%s3690_s1 + $0xe0] sm:$0xff] (!%p191_p9) }
  0x15   : > { %s219_s15 = scalar_select %p218_p10, %s2816_s22, 1  ;;  %2223 = vmatpush3.bf16.msra.mxu0 %v2222_v13  ;;  %v539_v21 = vld [vmem:[%s3690_s1 + $0x58] sm:$0xff]  ;;  %vm3209_vm5 = vmpackc.low %vm477_vm2, %vm477_vm2 }
  0x16   : > { %2225 = vmatprep.subr.bf16.mxu0 %v2224_v16 }
  0x17   : > { %s2336_s10 = smul.u32 160, %s219_s15  ;;  %s2759_s15 = smov 96  }
  0x19   : > { %s2893_s7 = scalar_lea.vmem %s3689_s0, %s2336_s10  ;;  %2227 = vmatpush3.bf16.msra.mxu0 %v2226_v26 }
  0x1a   : > { %v2905_v23 = vld [vmem:[%s2893_s7 + $0x10] sm:$0xff]  ;;  %v226_v24 = vld [vmem:[%s2893_s7 + $0x18] sm:$0x3]  ;;  %v2913_v30 = vld [vmem:[%s2893_s7] sm:$0xff]  ;;  %2229 = vmatprep.subr.bf16.mxu0 %v2228_v32 }
  0x1b   : > { %v2909_v25 = vld [vmem:[%s2893_s7 + $0x30] sm:$0xff]  ;;  %v264_v27 = vrot.slane %v226_v24, 1  ;;  %v312_v28 = vrot.slane %v2905_v23, 2  ;;  %v313_v29 = vrot.slane %v226_v24, 2  ;;  %v224_v31 = vld [vmem:[%s2893_s7 + $0x8] sm:$0x3] }
  0x1c   : > { %v260_v33 = vrot.slane %v2913_v30, 1  ;;  %v261_v34 = vrot.slane %v224_v31, 1  ;;  %v310_v35 = vrot.slane %v224_v31, 2  ;;  %v2918_v36 = vld [vmem:[%s2893_s7 + $0x20] sm:$0xff]  ;;  %v228_v37 = vld [vmem:[%s2893_s7 + $0x28] sm:$0x3] }
  0x1d   : > { %v314_v39 = vsel %vm308_vm1, %v312_v28, %v313_v29  ;;  %v266_v40 = vrot.slane %v2918_v36, 1  ;;  %v267_v41 = vrot.slane %v228_v37, 1  ;;  %v316_v42 = vrot.slane %v228_v37, 2  ;;  %v230_v43 = vld [vmem:[%s2893_s7 + $0x38] sm:$0x3]  ;;  %v2955_v0 = vld [vmem:[%s2893_s7 + $0x40] sm:$0xff]  ;;  %2231 = vmatpush3.bf16.msra.mxu0 %v2230_v38 }
  0x1e   : > { %v262_v44 = vsel %vm259_vm0, %v260_v33, %v261_v34  ;;  %v309_v45 = vrot.slane %v2913_v30, 2  ;;  %v263_v46 = vrot.slane %v2905_v23, 1  ;;  %v315_v50 = vrot.slane %v2918_v36, 2  ;;  %v232_v1 = vld [vmem:[%s2893_s7 + $0x48] sm:$0x3]  ;;  %2233 = vmatprep.subr.bf16.mxu0 %v2232_v47  ;;  %v2969_v10 = vld [vmem:[%s2893_s7 + $0x50] sm:$0xff] }
  0x1f   : > { %v2382_v48 = vpack.i.bf16 %v262_v44, %v314_v39  ;;  %v2928_v49 = vsel %vm259_vm0, %v266_v40, %v267_v41  ;;  %v269_v51 = vrot.slane %v2909_v25, 1  ;;  %v270_v55 = vrot.slane %v230_v43, 1  ;;  %v234_v11 = vld [vmem:[%s2893_s7 + $0x58] sm:$0x3]  ;;  %v557_v24 = vld [vmem:[%s3690_s1 + $0xe8] sm:$0xff]  ;;  %v3016_v33 = vld [vmem:[%s2893_s7 + $0x60] sm:$0xff] }
  0x20   : > { %v2392_v52 = vpack.i.bf16 %v2905_v23, %v2928_v49  ;;  %v311_v53 = vsel %vm308_vm1, %v309_v45, %v310_v35  ;;  %v2936_v54 = vsel %vm259_vm0, %v263_v46, %v264_v27  ;;  %v317_v59 = vsel %vm308_vm1, %v315_v50, %v316_v42  ;;  %v560_v27 = vld [vmem:[%s3690_s1 + $0x100] sm:$0xff]  ;;  %v561_v28 = vld [vmem:[%s3690_s1 + $0x108] sm:$0xff]  ;;  %v562_v34 = vld [vmem:[%s3690_s1 + $0x110] sm:$0xff] }
  0x21   : > { %2383 = vrot.lane.b32.xlu0 %v2382_v48, %s2758_s25  ;;  %v2387_v58 = vpack.i.bf16 %v311_v53, %v2918_v36  ;;  %v2397_v60 = vpack.i.bf16 %v2936_v54, %v317_v59  ;;  %v318_v61 = vrot.slane %v2909_v25, 2  ;;  %v319_v62 = vrot.slane %v230_v43, 2  ;;  %2128 = vmatprep.mubr.msk.f32.mxu1 %vm477_vm2, %v317_v59  ;;  %v563_v35 = vld [vmem:[%s3690_s1 + $0x118] sm:$0xff]  ;;  %v236_v38 = vld [vmem:[%s2893_s7 + $0x68] sm:$0x3]  ;;  %v540_v42 = vld [vmem:[%s3690_s1 + $0x60] sm:$0xff] }
  0x22   : > { %2393 = vrot.lane.b32.xlu1 %v2392_v52, %s2759_s15  ;;  %v2952_v63 = vsel %vm259_vm0, %v269_v51, %v270_v55  ;;  %v2402_v3 = vpack.i.bf16 %v314_v39, %v2909_v25  ;;  %v272_v6 = vrot.slane %v2955_v0, 1  ;;  %v273_v7 = vrot.slane %v232_v1, 1  ;;  %2235 = vmatpush3.bf16.msra.mxu0 %v2234_v2  ;;  %v541_v43 = vld [vmem:[%s3690_s1 + $0x68] sm:$0xff]  ;;  %v558_v44 = vld [vmem:[%s3690_s1 + $0xf0] sm:$0xff]  ;;  %v559_v45 = vld [vmem:[%s3690_s1 + $0xf8] sm:$0xff] }
  0x23   : > { %v2407_v4 = vpack.i.bf16 %v2918_v36, %v2952_v63  ;;  %v2964_v5 = vsel %vm308_vm1, %v318_v61, %v319_v62  ;;  %v321_v8 = vrot.slane %v2955_v0, 2  ;;  %v322_v9 = vrot.slane %v232_v1, 2  ;;  %v3056_v61 = vld [vmem:[%s2893_s7 + $0x70] sm:$0xff]  ;;  %v238_v62 = vld [vmem:[%s2893_s7 + $0x78] sm:$0x3] }
  0x24   : > { %v2412_v12 = vpack.i.bf16 %v2928_v49, %v2964_v5  ;;  %v2417_v13 = vpack.i.bf16 %v317_v59, %v2955_v0  ;;  %v2978_v14 = vsel %vm259_vm0, %v272_v6, %v273_v7  ;;  %v275_v16 = vrot.slane %v2969_v10, 1  ;;  %v542_v59 = vld [vmem:[%s3690_s1 + $0x70] sm:$0xff] }
  0x25   : > { %2388 = vrot.lane.b32.xlu0 %v2387_v58, %s2760_s26  ;;  %v2981_v15 = vsel %vm308_vm1, %v321_v8, %v322_v9  ;;  %v276_v17 = vrot.slane %v234_v11, 1  ;;  %v2422_v26 = vpack.i.bf16 %v2909_v25, %v2978_v14  ;;  %v324_v31 = vrot.slane %v2969_v10, 2 }
  0x26   : > { %2398 = vrot.lane.b32.xlu1 %v2397_v60, %s2758_s25  ;;  %v2427_v29 = vpack.i.bf16 %v2952_v63, %v2981_v15  ;;  %v325_v32 = vrot.slane %v234_v11, 2  ;;  %v2236_v39 = vpack.c.bf16 %v555_v19, %v554_v18  ;;  %v2238_v40 = vpack.c.bf16 %v539_v21, %v538_v20  ;;  %v543_v60 = vld [vmem:[%s3690_s1 + $0x78] sm:$0xff]  ;;  %v240_v18 = vld [vmem:[%s2893_s7 + $0x88] sm:$0x3] }
  0x27   : > { %v3025_v37 = vsel %vm259_vm0, %v275_v16, %v276_v17  ;;  %v2240_v41 = vpack.c.bf16 %v557_v24, %v556_v22  ;;  %v2248_v46 = vpack.c.bf16 %v561_v28, %v560_v27  ;;  %v2432_v47 = vpack.i.bf16 %v2964_v5, %v2969_v10  ;;  %v239_v17 = vld [vmem:[%s2893_s7 + $0x80] sm:$0xff]  ;;  %v242_v28 = vld [vmem:[%s2893_s7 + $0x98] sm:$0x3] }
  0x28   : > { %v278_v48 = vrot.slane %v3016_v33, 1  ;;  %2237 = vmatprep.subr.bf16.mxu0 %v2236_v39  ;;  %v2252_v50 = vpack.c.bf16 %v563_v35, %v562_v34  ;;  %v2437_v51 = vpack.i.bf16 %v2955_v0, %v3025_v37  ;;  %v326_v52 = vsel %vm308_vm1, %v324_v31, %v325_v32 }
  0x29   : > { %2403 = vrot.lane.b32.xlu0 %v2402_v3, %s2760_s26  ;;  %v279_v53 = vrot.slane %v236_v38, 1  ;;  %2239 = vmatpush3.bf16.msra.mxu0 %v2238_v40  ;;  %v2242_v55 = vpack.c.bf16 %v541_v43, %v540_v42  ;;  %v327_v56 = vrot.slane %v3016_v33, 2  ;;  %v328_v57 = vrot.slane %v236_v38, 2 }
  0x2a   : > { %2408 = vrot.lane.b32.xlu1 %v2407_v4, %s2759_s15  ;;  %2241 = vmatprep.subr.bf16.mxu0 %v2240_v41  ;;  %v2244_v58 = vpack.c.bf16 %v559_v45, %v558_v44  ;;  %v2442_v1 = vpack.i.bf16 %v2978_v14, %v326_v52  ;;  %v2447_v2 = vpack.i.bf16 %v2981_v15, %v3016_v33  ;;  %v281_v7 = vrot.slane %v3056_v61, 1 }
  0x2b   : > { %2249 = vmatprep.subr.bf16.mxu1 %v2248_v46  ;;  %v3065_v3 = vsel %vm259_vm0, %v278_v48, %v279_v53  ;;  %v2246_v4 = vpack.c.bf16 %v543_v60, %v542_v59  ;;  %v329_v6 = vsel %vm308_vm1, %v327_v56, %v328_v57  ;;  %v282_v8 = vrot.slane %v238_v62, 1 }
  0x2c   : > { %2251 = vmatpush3.bf16.msra.mxu1 %v2248_v46  ;;  %v2452_v9 = vpack.i.bf16 %v2969_v10, %v3065_v3  ;;  %v2457_v11 = vpack.i.bf16 %v3025_v37, %v329_v6  ;;  %v2462_v19 = vpack.i.bf16 %v326_v52, %v3056_v61  ;;  %v383_v22 = vrot.slane %v239_v17, 1 }
  0x2d   : > { %2413 = vrot.lane.b32.xlu0 %v2412_v12, %s2758_s25  ;;  %2253 = vmatprep.subr.bf16.mxu1 %v2252_v50  ;;  %v330_v12 = vrot.slane %v3056_v61, 2  ;;  %v3076_v16 = vsel %vm259_vm0, %v281_v7, %v282_v8  ;;  %v384_v24 = vrot.slane %v240_v18, 1  ;;  %v395_v27 = vrot.slane %v240_v18, 2 }
  0x2e   : > { %2418 = vrot.lane.b32.xlu1 %v2417_v13, %s2760_s26  ;;  %2243 = vmatpush3.bf16.msra.mxu0 %v2242_v55  ;;  %v331_v13 = vrot.slane %v238_v62, 2  ;;  %v2467_v20 = vpack.i.bf16 %v3016_v33, %v3076_v16  ;;  %v475_v31 = vrot.slane %v242_v28, 2  ;;  %v2477_v32 = vpack.i.bf16 %v329_v6, %v239_v17 }
  0x2f   : > { %2245 = vmatprep.subr.bf16.mxu0 %v2244_v58  ;;  %v3098_v34 = vsel %vm259_vm0, %v383_v22, %v384_v24  ;;  %v448_v39 = vrot.slane %v242_v28, 1 }
  0x30   : > { %2255 = vmatpush3.bf16.msra.mxu1 %v2252_v50  ;;  %v332_v21 = vsel %vm308_vm1, %v330_v12, %v331_v13  ;;  %v2482_v41 = vpack.i.bf16 %v3056_v61, %v3098_v34 }
  0x31   : > { %2423 = vrot.lane.b32.xlu0 %v2422_v26, %s2759_s15  ;;  %v394_v26 = vrot.slane %v239_v17, 2 }
  0x32   : > { %2428 = vrot.lane.b32.xlu1 %v2427_v29, %s2758_s25  ;;  %2247 = vmatpush3.bf16.msra.mxu0 %v2246_v4 }
  0x33   : > { %2129 = vmatmul.mubr.msk.f32.vlgmr.msra.gmra.mrb[0].mxu1 %vm477_vm2, %v2964_v5  ;;  %v241_v5 = vld [vmem:[%s2893_s7 + $0x90] sm:$0xff]  ;;  %v396_v35 = vsel %vm308_vm1, %v394_v26, %v395_v27 }
  0x34   : > { %2131 = vmatprep.mubr.msk.f32.mxu1 %vm477_vm2, %v2981_v15  ;;  %v2472_v15 = vpack.i.bf16 %v3065_v3, %v332_v21  ;;  %v474_v29 = vrot.slane %v241_v5, 2  ;;  %v447_v38 = vrot.slane %v241_v5, 1  ;;  %v2487_v42 = vpack.i.bf16 %v3076_v16, %v396_v35 }
  0x35   : > { %2433 = vrot.lane.b32.xlu0 %v2432_v47, %s2760_s26  ;;  %v2492_v44 = vpack.i.bf16 %v332_v21, %v241_v5 }
  0x36   : > { %2438 = vrot.lane.b32.xlu1 %v2437_v51, %s2759_s15  ;;  %v476_v40 = vsel %vm308_vm1, %v474_v29, %v475_v31  ;;  %v449_v43 = vsel %vm259_vm0, %v447_v38, %v448_v39 }
  0x37   : > { %2132 = vmatmul.mubr.msk.f32.gmra.mrb[2].mxu1 %vm477_vm2, %v326_v52  ;;  %v2497_v45 = vpack.i.bf16 %v239_v17, %v449_v43 }
  0x38   : > { %2134 = vmatprep.mubr.msk.f32.mxu1 %vm477_vm2, %v329_v6 }
  0x39   : > { %2443 = vrot.lane.b32.xlu0 %v2442_v1, %s2758_s25 }
  0x3a   : > { %2448 = vrot.lane.b32.xlu1 %v2447_v2, %s2760_s26 }
  0x3b   : > { %2135 = vmatmul.mubr.msk.f32.gmra.mrb[4].mxu1 %vm477_vm2, %v332_v21 }
  0x3c   : > { %2137 = vmatprep.mubr.msk.f32.mxu1 %vm477_vm2, %v396_v35 }
  0x3d   : > { %2453 = vrot.lane.b32.xlu0 %v2452_v9, %s2759_s15 }
  0x3e   : > { %2458 = vrot.lane.b32.xlu1 %v2457_v11, %s2758_s25 }
  0x3f   : > { %2138 = vmatmul.mubr.msk.f32.gmra.mrb[6].mxu1 %vm477_vm2, %v476_v40 }
  0x41   : > { %2463 = vrot.lane.b32.xlu0 %v2462_v19, %s2760_s26 }
  0x42   : > { %2468 = vrot.lane.b32.xlu1 %v2467_v20, %s2759_s15 }
  0x45   : > { %2473 = vrot.lane.b32.xlu0 %v2472_v15, %s2758_s25 }
  0x46   : > { %2478 = vrot.lane.b32.xlu1 %v2477_v32, %s2760_s26 }
  0x49   : > { %2483 = vrot.lane.b32.xlu0 %v2482_v41, %s2759_s15 }
  0x4a   : > { %2488 = vrot.lane.b32.xlu1 %v2487_v42, %s2758_s25 }
  0x4d   : > { %2493 = vrot.lane.b32.xlu0 %v2492_v44, %s2760_s26 }
  0x4e   : > { %2498 = vrot.lane.b32.xlu1 %v2497_v45, %s2759_s15 }
  0x93   : > { %v2384_v46 = vpop.permute.xlu0 %2383 }
  0x94   : > { %v2394_v47 = vpop.permute.xlu1 %2393  ;;  %v2386_v48 = vunpack.i.h.bf16 %v2384_v46  ;;  %v2385_v50 = vunpack.i.l.bf16 %v2384_v46 }
  0x95   : > { %v2396_v52 = vunpack.i.h.bf16 %v2394_v47  ;;  %v2395_v53 = vunpack.i.l.bf16 %v2394_v47 }
  0x96   : > { %v504_v60 = vsel %vm477_vm2, %v2936_v54, %v2385_v50  ;;  %v478_v62 = vsel %vm477_vm2, %v2913_v30, %v2386_v48 }
  0x97   : > { %v2389_v51 = vpop.permute.xlu0 %2388 }
  0x98   : > { %v2391_v55 = vunpack.i.h.bf16 %v2389_v51  ;;  %v2390_v56 = vunpack.i.l.bf16 %v2389_v51  ;;  %v2399_v57 = vpop.permute.xlu1 %2398 }
  0x99   : > { %v2401_v58 = vunpack.i.h.bf16 %v2399_v57  ;;  %v2400_v59 = vunpack.i.l.bf16 %v2399_v57 }
  0x9a   : > { %v512_v1 = vsel %vm486_vm3, %v504_v60, %v2390_v56  ;;  %v487_v2 = vsel %vm486_vm3, %v478_v62, %v2391_v55 }
  0x9b   : > { %v2404_v4 = vpop.permute.xlu0 %2403  ;;  %v520_v6 = vsel %vm495_vm4, %v512_v1, %v2395_v53  ;;  %v496_v7 = vsel %vm495_vm4, %v487_v2, %v2396_v52  ;;  %v505_v54 = vsel %vm477_vm2, %v2928_v49, %v2400_v59  ;;  %v479_v30 = vsel %vm477_vm2, %v2905_v23, %v2401_v58 }
  0x9c   : > { %v2406_v8 = vunpack.i.h.bf16 %v2404_v4  ;;  %v2405_v9 = vunpack.i.l.bf16 %v2404_v4  ;;  %v2409_v11 = vpop.permute.xlu1 %2408  ;;  %651 = vmatprep.mubr.f32.mxu0 %v520_v6 }
  0x9d   : > { %v2411_v12 = vunpack.i.h.bf16 %v2409_v11  ;;  %v2410_v13 = vunpack.i.l.bf16 %v2409_v11  ;;  %652 = vmatmul.mubr.f32.vlgmr.msra.gmra.mrb[0].mxu0 %v496_v7 }
  0x9e   : > { %v513_v17 = vsel %vm486_vm3, %v505_v54, %v2405_v9  ;;  %v488_v18 = vsel %vm486_vm3, %v479_v30, %v2406_v8 }
  0x9f   : > { %v2414_v19 = vpop.permute.xlu0 %2413  ;;  %v521_v20 = vsel %vm495_vm4, %v513_v17, %v2410_v13  ;;  %v497_v21 = vsel %vm495_vm4, %v488_v18, %v2411_v12 }
  0xa0   : > { %v2416_v22 = vunpack.i.h.bf16 %v2414_v19  ;;  %v2415_v24 = vunpack.i.l.bf16 %v2414_v19  ;;  %v2419_v26 = vpop.permute.xlu1 %2418  ;;  %656 = vmatprep.mubr.f32.mxu0 %v521_v20 }
  0xa1   : > { %v2421_v27 = vunpack.i.h.bf16 %v2419_v26  ;;  %v2420_v5 = vunpack.i.l.bf16 %v2419_v26  ;;  %657 = vmatmul.mubr.f32.gmra.mrb[2].mxu0 %v497_v21 }
  0xa2   : > { %v506_v49 = vsel %vm477_vm2, %v2952_v63, %v2415_v24  ;;  %v480_v23 = vsel %vm477_vm2, %v2918_v36, %v2416_v22 }
  0xa3   : > { %v2424_v28 = vpop.permute.xlu0 %2423  ;;  %v514_v38 = vsel %vm486_vm3, %v506_v49, %v2420_v5  ;;  %v489_v39 = vsel %vm486_vm3, %v480_v23, %v2421_v27 }
  0xa4   : > { %v2426_v15 = vunpack.i.h.bf16 %v2424_v28  ;;  %v2425_v29 = vunpack.i.l.bf16 %v2424_v28  ;;  %v2429_v31 = vpop.permute.xlu1 %2428 }
  0xa5   : > { %v2431_v32 = vunpack.i.h.bf16 %v2429_v31  ;;  %v2430_v35 = vunpack.i.l.bf16 %v2429_v31 }
  0xa6   : > { %v522_v40 = vsel %vm495_vm4, %v514_v38, %v2425_v29  ;;  %v498_v41 = vsel %vm495_vm4, %v489_v39, %v2426_v15 }
  0xa7   : > { %v2434_v42 = vpop.permute.xlu0 %2433  ;;  %661 = vmatprep.mubr.f32.mxu0 %v522_v40  ;;  %v507_v46 = vsel %vm477_vm2, %v2978_v14, %v2430_v35  ;;  %v481_v47 = vsel %vm477_vm2, %v2909_v25, %v2431_v32 }
  0xa8   : > { %v2436_v63 = vunpack.i.h.bf16 %v2434_v42  ;;  %v2435_v43 = vunpack.i.l.bf16 %v2434_v42  ;;  %v2439_v44 = vpop.permute.xlu1 %2438  ;;  %662 = vmatmul.mubr.f32.gmra.mrb[4].mxu0 %v498_v41 }
  0xa9   : > { %v2441_v36 = vunpack.i.h.bf16 %v2439_v44  ;;  %v2440_v45 = vunpack.i.l.bf16 %v2439_v44 }
  0xaa   : > { %v515_v48 = vsel %vm486_vm3, %v507_v46, %v2435_v43  ;;  %v490_v50 = vsel %vm486_vm3, %v481_v47, %v2436_v63 }
  0xab   : > { %v2444_v51 = vpop.permute.xlu0 %2443  ;;  %v523_v52 = vsel %vm495_vm4, %v515_v48, %v2440_v45  ;;  %v499_v53 = vsel %vm495_vm4, %v490_v50, %v2441_v36 }
  0xac   : > { %v2446_v55 = vunpack.i.h.bf16 %v2444_v51  ;;  %v2445_v56 = vunpack.i.l.bf16 %v2444_v51  ;;  %v2449_v57 = vpop.permute.xlu1 %2448  ;;  %666 = vmatprep.mubr.f32.mxu0 %v523_v52 }
  0xad   : > { %v2451_v58 = vunpack.i.h.bf16 %v2449_v57  ;;  %v2450_v59 = vunpack.i.l.bf16 %v2449_v57  ;;  %667 = vmatmul.mubr.f32.gmra.mrb[6].mxu0 %v499_v53 }
  0xae   : > { %v508_v14 = vsel %vm477_vm2, %v3025_v37, %v2445_v56  ;;  %v482_v25 = vsel %vm477_vm2, %v2955_v0, %v2446_v55 }
  0xaf   : > { %v2454_v60 = vpop.permute.xlu0 %2453  ;;  %v516_v7 = vsel %vm486_vm3, %v508_v14, %v2450_v59  ;;  %v491_v8 = vsel %vm486_vm3, %v482_v25, %v2451_v58  ;;  %v1904_v14 = vld [vmem:[%s3691_s2] ss:$0 sm:$0xff] }
  0xb0   : > { %v2456_v62 = vunpack.i.h.bf16 %v2454_v60  ;;  %v2455_v1 = vunpack.i.l.bf16 %v2454_v60  ;;  %v2459_v2 = vpop.permute.xlu1 %2458 }
  0xb1   : > { %v2461_v4 = vunpack.i.h.bf16 %v2459_v2  ;;  %v2460_v6 = vunpack.i.l.bf16 %v2459_v2 }
  0xb2   : > { %v524_v9 = vsel %vm495_vm4, %v516_v7, %v2455_v1  ;;  %v500_v11 = vsel %vm495_vm4, %v491_v8, %v2456_v62 }
  0xb3   : > { %v2464_v12 = vpop.permute.xlu0 %2463  ;;  %671 = vmatprep.mubr.f32.mxu0 %v524_v9  ;;  %v509_v17 = vsel %vm477_vm2, %v3065_v3, %v2460_v6  ;;  %v483_v18 = vsel %vm477_vm2, %v2969_v10, %v2461_v4 }
  0xb4   : > { %v2466_v37 = vunpack.i.h.bf16 %v2464_v12  ;;  %v2465_v13 = vunpack.i.l.bf16 %v2464_v12  ;;  %v2469_v54 = vpop.permute.xlu1 %2468  ;;  %672 = vmatmul.mubr.f32.gmra.mrb[8].mxu0 %v500_v11 }
  0xb5   : > { %v2471_v0 = vunpack.i.h.bf16 %v2469_v54  ;;  %v2470_v30 = vunpack.i.l.bf16 %v2469_v54 }
  0xb6   : > { %v517_v19 = vsel %vm486_vm3, %v509_v17, %v2465_v13  ;;  %v492_v20 = vsel %vm486_vm3, %v483_v18, %v2466_v37 }
  0xb7   : > { %v2474_v21 = vpop.permute.xlu0 %2473  ;;  %v525_v22 = vsel %vm495_vm4, %v517_v19, %v2470_v30  ;;  %v501_v24 = vsel %vm495_vm4, %v492_v20, %v2471_v0 }
  0xb8   : > { %v2476_v26 = vunpack.i.h.bf16 %v2474_v21  ;;  %v2475_v27 = vunpack.i.l.bf16 %v2474_v21  ;;  %v2479_v5 = vpop.permute.xlu1 %2478  ;;  %676 = vmatprep.mubr.f32.mxu0 %v525_v22 }
  0xb9   : > { %v2481_v49 = vunpack.i.h.bf16 %v2479_v5  ;;  %v2480_v23 = vunpack.i.l.bf16 %v2479_v5  ;;  %677 = vmatmul.mubr.f32.gmra.mrb[10].mxu0 %v501_v24 }
  0xba   : > { %v510_v3 = vsel %vm477_vm2, %v3076_v16, %v2475_v27  ;;  %v484_v10 = vsel %vm477_vm2, %v3016_v33, %v2476_v26 }
  0xbb   : > { %v2484_v28 = vpop.permute.xlu0 %2483  ;;  %v518_v38 = vsel %vm486_vm3, %v510_v3, %v2480_v23  ;;  %v493_v39 = vsel %vm486_vm3, %v484_v10, %v2481_v49 }
  0xbc   : > { %v2486_v15 = vunpack.i.h.bf16 %v2484_v28  ;;  %v2485_v29 = vunpack.i.l.bf16 %v2484_v28  ;;  %v2489_v31 = vpop.permute.xlu1 %2488 }
  0xbd   : > { %v2491_v32 = vunpack.i.h.bf16 %v2489_v31  ;;  %v2490_v35 = vunpack.i.l.bf16 %v2489_v31 }
  0xbe   : > { %v526_v40 = vsel %vm495_vm4, %v518_v38, %v2485_v29  ;;  %v502_v41 = vsel %vm495_vm4, %v493_v39, %v2486_v15 }
  0xbf   : > { %v2494_v42 = vpop.permute.xlu0 %2493  ;;  %681 = vmatprep.mubr.f32.mxu0 %v526_v40  ;;  %v511_v36 = vsel %vm477_vm2, %v3098_v34, %v2490_v35  ;;  %v485_v45 = vsel %vm477_vm2, %v3056_v61, %v2491_v32 }
  0xc0   : > { %v2496_v16 = vunpack.i.h.bf16 %v2494_v42  ;;  %v2495_v63 = vunpack.i.l.bf16 %v2494_v42  ;;  %v2499_v43 = vpop.permute.xlu1 %2498  ;;  %682 = vmatmul.mubr.f32.gmra.mrb[12].mxu0 %v502_v41 }
  0xc1   : > { %v2501_v33 = vunpack.i.h.bf16 %v2499_v43  ;;  %v2500_v44 = vunpack.i.l.bf16 %v2499_v43 }
  0xc2   : > { %v519_v46 = vsel %vm486_vm3, %v511_v36, %v2495_v63  ;;  %v494_v47 = vsel %vm486_vm3, %v485_v45, %v2496_v16 }
  0xc3   : > { %v527_v48 = vsel %vm495_vm4, %v519_v46, %v2500_v44  ;;  %v503_v50 = vsel %vm495_vm4, %v494_v47, %v2501_v33 }
  0xc4   : > { %686 = vmatprep.mubr.f32.mxu0 %v527_v48 }
  0xc5   : > { %687 = vmatmul.mubr.f32.gmra.mrb[14].mxu0 %v503_v50 }
 0x106   : > { %v2130_v51 = vpop.f32.mrb[0].mxu1 }
 0x107   : > { %v758_v52 = vpop.f32.mrb[1].mxu1 }
 0x10a   : > { %v2133_v53 = vpop.f32.mrb[2].mxu1 }
 0x10b   : > { %v768_v55 = vpop.f32.mrb[3].mxu1 }
 0x10e   : > { %v2136_v56 = vpop.f32.mrb[4].mxu1 }
 0x10f   : > { %v778_v57 = vpop.f32.mrb[5].mxu1 }
 0x112   : > { %v2139_v34 = vpop.f32.mrb[6].mxu1 }
 0x113   : > { %v788_v58 = vpop.f32.mrb[7].mxu1 }
 0x170   : > { %v1984_v59 = vpop.f32.mrb[0].mxu0 }
 0x171   : > { %v1985_v61 = vpop.f32.mrb[1].mxu0 }
 0x172   : > { %v1986_v25 = vadd.f32 %v1985_v61, %v1984_v59 }
 0x174   : > { %v1987_v60 = vpop.f32.mrb[2].mxu0  ;;  %v654_v62 = vadd.f32 %v1986_v25, %v1904_v14 }
 0x175   : > { %v1988_v1 = vpop.f32.mrb[3].mxu0 }
 0x176   : > { %v1989_v2 = vadd.f32 %v1988_v1, %v1987_v60  ;;  %v759_v4 = vadd.f32 %v758_v52, %v654_v62 }
 0x178   : > { %v659_v6 = vadd.f32 %v1989_v2, %v1904_v14  ;;  %v797_v7 = vmax.f32 %v759_v4, 0.0 }
 0x17a   : > { %v3182_v8 = vadd.f32 %v2130_v51, %v659_v6  ;;  %2156 = vmatprep.mubr.msk.f32.mxu1 %vm477_vm2, %v797_v7 }
 0x17b   : > { %v1990_v9 = vpop.f32.mrb[4].mxu0 }
 0x17c   : > { %v798_v11 = vmax.f32 %v3182_v8, 0.0  ;;  %v1991_v12 = vpop.f32.mrb[5].mxu0 }
 0x17d   : > { %v1992_v37 = vadd.f32 %v1991_v12, %v1990_v9 }
 0x17e   : > { %v3188_v13 = vpack.i.bf16 %v798_v11, %v797_v7 }
 0x17f   : > { %v664_v54 = vadd.f32 %v1992_v37, %v1904_v14 }
 0x180   : > { %v1993_v0 = vpop.f32.mrb[6].mxu0  ;;  %2503 = vrot.lane.b32.xlu0 %v3188_v13, %s2759_s15 }
 0x181   : > { %v3192_v30 = vadd.f32 %v768_v55, %v664_v54  ;;  %v1994_v17 = vpop.f32.mrb[7].mxu0 }
 0x182   : > { %v1995_v18 = vadd.f32 %v1994_v17, %v1993_v0 }
 0x183   : > { %v799_v22 = vmax.f32 %v3192_v30, 0.0 }
 0x184   : > { %v669_v19 = vadd.f32 %v1995_v18, %v1904_v14 }
 0x186   : > { %v774_v20 = vadd.f32 %v2133_v53, %v669_v19 }
 0x187   : > { %v1996_v21 = vpop.f32.mrb[8].mxu0 }
 0x188   : > { %v800_v24 = vmax.f32 %v774_v20, 0.0  ;;  %v1997_v26 = vpop.f32.mrb[9].mxu0 }
 0x189   : > { %v1998_v27 = vadd.f32 %v1997_v26, %v1996_v21 }
 0x18a   : > { %v3195_v5 = vpack.i.bf16 %v800_v24, %v799_v22 }
 0x18b   : > { %v674_v49 = vadd.f32 %v1998_v27, %v1904_v14 }
 0x18c   : > { %v1999_v23 = vpop.f32.mrb[10].mxu0  ;;  %2508 = vrot.lane.b32.xlu1 %v3195_v5, %s2759_s15 }
 0x18d   : > { %v779_v3 = vadd.f32 %v778_v57, %v674_v49  ;;  %v2000_v10 = vpop.f32.mrb[11].mxu0 }
 0x18e   : > { %v2001_v28 = vadd.f32 %v2000_v10, %v1999_v23 }
 0x18f   : > { %v801_v32 = vmax.f32 %v779_v3, 0.0 }
 0x190   : > { %v679_v15 = vadd.f32 %v2001_v28, %v1904_v14 }
 0x192   : > { %v784_v29 = vadd.f32 %v2136_v56, %v679_v15 }
 0x193   : > { %v2002_v31 = vpop.f32.mrb[12].mxu0 }
 0x194   : > { %v802_v35 = vmax.f32 %v784_v29, 0.0  ;;  %v2003_v38 = vpop.f32.mrb[13].mxu0 }
 0x195   : > { %v2004_v39 = vadd.f32 %v2003_v38, %v2002_v31 }
 0x196   : > { %v3199_v40 = vpack.i.bf16 %v802_v35, %v801_v32 }
 0x197   : > { %v684_v41 = vadd.f32 %v2004_v39, %v1904_v14 }
 0x198   : > { %v2005_v42 = vpop.f32.mrb[14].mxu0  ;;  %2513 = vrot.lane.b32.xlu0 %v3199_v40, %s2759_s15 }
 0x199   : > { %v789_v16 = vadd.f32 %v788_v58, %v684_v41  ;;  %v2006_v63 = vpop.f32.mrb[15].mxu0 }
 0x19a   : > { %v2007_v43 = vadd.f32 %v2006_v63, %v2005_v42 }
 0x19b   : > { %v803_v36 = vmax.f32 %v789_v16, 0.0 }
 0x19c   : > { %v689_v33 = vadd.f32 %v2007_v43, %v1904_v14 }
 0x19e   : > { %v794_v44 = vadd.f32 %v2139_v34, %v689_v33 }
 0x1a0   : > { %v804_v45 = vmax.f32 %v794_v44, 0.0 }
 0x1a2   : > { %v3203_v46 = vpack.i.bf16 %v804_v45, %v803_v36 }
 0x1a4   : > { %2518 = vrot.lane.b32.xlu1 %v3203_v46, %s2759_s15 }
 0x1f2   : > { %v2504_v47 = vpop.permute.xlu0 %2503 }
 0x1f3   : > { %v2506_v48 = vunpack.i.h.bf16 %v2504_v47  ;;  %v2505_v50 = vunpack.i.l.bf16 %v2504_v47 }
 0x1f5   : > { %v2256_v52 = vpack.c.bf16 %v2506_v48, %v2505_v50 }
 0x1f7   : > { %2258 = vmatprep.subr.msk.bf16.mxu1 %vm3209_vm5, %v2256_v52 }
 0x1f8   : > { %2261 = vmatpush3.bf16.xpose.msk.msra.mxu1 %vm3209_vm5, %v2256_v52 }
 0x1fe   : > { %v2509_v53 = vpop.permute.xlu1 %2508 }
 0x1ff   : > { %v2511_v55 = vunpack.i.h.bf16 %v2509_v53  ;;  %v2510_v56 = vunpack.i.l.bf16 %v2509_v53 }
 0x201   : > { %v2262_v57 = vpack.c.bf16 %v2511_v55, %v2510_v56 }
 0x203   : > { %2264 = vmatprep.subr.msk.bf16.mxu1 %vm3209_vm5, %v2262_v57 }
 0x204   : > { %2267 = vmatpush3.bf16.xpose.msk.msra.mxu1 %vm3209_vm5, %v2262_v57 }
 0x20a   : > { %v2514_v34 = vpop.permute.xlu0 %2513 }
 0x20b   : > { %v2516_v58 = vunpack.i.h.bf16 %v2514_v34  ;;  %v2515_v59 = vunpack.i.l.bf16 %v2514_v34 }
 0x20d   : > { %v2268_v61 = vpack.c.bf16 %v2516_v58, %v2515_v59 }
 0x20f   : > { %2270 = vmatprep.subr.msk.bf16.mxu1 %vm3209_vm5, %v2268_v61 }
 0x210   : > { %2273 = vmatpush3.bf16.xpose.msk.msra.mxu1 %vm3209_vm5, %v2268_v61 }
 0x216   : > { %v2519_v14 = vpop.permute.xlu1 %2518 }
 0x217   : > { %v2521_v25 = vunpack.i.h.bf16 %v2519_v14  ;;  %v2520_v60 = vunpack.i.l.bf16 %v2519_v14 }
 0x219   : > { %v2274_v62 = vpack.c.bf16 %v2521_v25, %v2520_v60 }
 0x21b   : > { %2276 = vmatprep.subr.msk.bf16.mxu1 %vm3209_vm5, %v2274_v62 }
 0x21c   : > { %2279 = vmatpush3.bf16.xpose.msk.msra.mxu1 %vm3209_vm5, %v2274_v62 }
 0x223   : > { %2157 = vmatmul.mubr.msk.f32.vlgmr.msra.gmra.mrb[8].mxu1 %vm477_vm2, %v798_v11 }
 0x224   : > { %2159 = vmatprep.mubr.msk.f32.mxu1 %vm477_vm2, %v799_v22 }
 0x227   : > { %2160 = vmatmul.mubr.msk.f32.gmra.mrb[10].mxu1 %vm477_vm2, %v800_v24 }
 0x228   : > { %2162 = vmatprep.mubr.msk.f32.mxu1 %vm477_vm2, %v801_v32 }
 0x22b   : > { %2163 = vmatmul.mubr.msk.f32.gmra.mrb[12].mxu1 %vm477_vm2, %v802_v35 }
 0x22c   : > { %2165 = vmatprep.mubr.msk.f32.mxu1 %vm477_vm2, %v803_v36 }
 0x22f   : > { %2166 = vmatmul.mubr.msk.f32.gmra.mrb[14].mxu1 %vm477_vm2, %v804_v45 }
 0x2f6   : > { %v2158_v1 = vpop.f32.mrb[8].mxu1 }
 0x2f7   : > { %v927_v2 = vpop.f32.mrb[9].mxu1  ;;  %v969_v4 = vsel %vm486_vm3, %v2158_v1, -inf }
 0x2f8   : > { %970 = vmax.xlane.f32.xlu1 %v969_v4  ;;  %v966_v6 = vsel %vm486_vm3, %v927_v2, -inf }
 0x2f9   : > { %967 = vmax.xlane.f32.xlu0 %v966_v6 }
 0x2fa   : > { %v2161_v7 = vpop.f32.mrb[10].mxu1 }
 0x2fb   : > { %v937_v8 = vpop.f32.mrb[11].mxu1  ;;  %v975_v9 = vsel %vm486_vm3, %v2161_v7, -inf }
 0x2fc   : > { %v972_v37 = vsel %vm486_vm3, %v937_v8, -inf }
 0x2fd   : > { %976 = vmax.xlane.f32.xlu0 %v975_v9 }
 0x2fe   : > { %v2164_v11 = vpop.f32.mrb[12].mxu1 }
 0x2ff   : > { %v947_v12 = vpop.f32.mrb[13].mxu1  ;;  %v981_v17 = vsel %vm486_vm3, %v2164_v11, -inf }
 0x300   : > { %v978_v54 = vsel %vm486_vm3, %v947_v12, -inf }
 0x301   : > { %973 = vmax.xlane.f32.xlu0 %v972_v37  ;;  %979 = vmax.xlane.f32.xlu1 %v978_v54 }
 0x302   : > { %v3243_v0 = vpop.f32.mrb[14].mxu1 }
 0x303   : > { %v3245_v30 = vpop.f32.mrb[15].mxu1  ;;  %v987_v19 = vsel %vm486_vm3, %v3243_v0, -inf }
 0x304   : > { %v984_v18 = vsel %vm486_vm3, %v3245_v30, -inf }
 0x305   : > { %982 = vmax.xlane.f32.xlu0 %v981_v17  ;;  %985 = vmax.xlane.f32.xlu1 %v984_v18 }
 0x309   : > { %988 = vmax.xlane.f32.xlu0 %v987_v19 }
 0x316   : > { %2523 = vrot.lane.b32.xlu1 %v3188_v13, %s2760_s26 }
 0x31f   : > { %2528 = vrot.lane.b32.xlu0 %v3195_v5, %s2760_s26 }
 0x385   : > { %v971_v20 = vpop.xlane.xlu1 %970 }
 0x386   : > { %v991_v21 = vsub.f32 %v2158_v1, %v971_v20  ;;  %v968_v22 = vpop.xlane.xlu0 %967 }
 0x387   : > { %v990_v24 = vsub.f32 %v927_v2, %v968_v22 }
 0x388   : > { %v1000_v26 = vmul.f32 1.442695, %v991_v21 }
 0x389   : > { %v998_v27 = vmul.f32 1.442695, %v990_v24 }
 0x38a   : > { %2662 = vpow2.f32 %v1000_v26  ;;  %v977_v49 = vpop.xlane.xlu0 %976 }
 0x38b   : > { %2664 = vpow2.f32 %v998_v27  ;;  %v993_v23 = vsub.f32 %v2161_v7, %v977_v49 }
 0x38d   : > { %v1004_v3 = vmul.f32 1.442695, %v993_v23 }
 0x38e   : > { %v974_v10 = vpop.xlane.xlu0 %973  ;;  %v980_v28 = vpop.xlane.xlu1 %979 }
 0x38f   : > { %2666 = vpow2.f32 %v1004_v3  ;;  %v992_v15 = vsub.f32 %v937_v8, %v974_v10  ;;  %v994_v29 = vsub.f32 %v947_v12, %v980_v28 }
 0x391   : > { %v1002_v13 = vmul.f32 1.442695, %v992_v15  ;;  %v1006_v31 = vmul.f32 1.442695, %v994_v29 }
 0x392   : > { %v983_v32 = vpop.xlane.xlu0 %982  ;;  %v986_v5 = vpop.xlane.xlu1 %985 }
 0x393   : > { %2668 = vpow2.f32 %v1002_v13  ;;  %v995_v35 = vsub.f32 %v2164_v11, %v983_v32  ;;  %v996_v59 = vsub.f32 %v3245_v30, %v986_v5  ;;  %v2761_v5 = vmov 0.0  }
 0x394   : > { %v3256_v38 = vpop.eup %2662  ;;  %2670 = vpow2.f32 %v1006_v31  ;;  %1212 = vst.msk [vmem:[#allocation2 + $0x20] sm:$0xff] %vm477_vm2, %v2761_v5  ;;  %1207 = vst.msk [vmem:[#allocation2] sm:$0xff] %vm477_vm2, %v2761_v5 }
 0x395   : > { %v2665_v39 = vpop.eup %2664  ;;  %v1008_v41 = vmul.f32 1.442695, %v995_v35  ;;  %v1017_v42 = vsel %vm486_vm3, %v3256_v38, 0.0  ;;  %v1010_v61 = vmul.f32 1.442695, %v996_v59  ;;  %1210 = vst.msk [vmem:[#allocation2 + $0x10] sm:$0xff] %vm477_vm2, %v2761_v5 }
 0x396   : > { %1018 = vadd.xlane.f32.xlu0 %v1017_v42  ;;  %v989_v16 = vpop.xlane.xlu0 %988  ;;  %v2524_v63 = vpop.permute.xlu1 %2523  ;;  %v1014_v43 = vsel %vm486_vm3, %v2665_v39, 0.0  ;;  %1213 = vst.msk [vmem:[#allocation2 + $0x28] sm:$0x3] %vm1208_vm6, %v2761_v5  ;;  %1209 = vst.msk [vmem:[#allocation2 + $0x8] sm:$0x3] %vm1208_vm6, %v2761_v5  ;;  %v1569_v35 = vld [vmem:[%s3692_s3 + $0x100] sm:$0xff] }
 0x397   : > { %2672 = vpow2.f32 %v1008_v41  ;;  %v2526_v33 = vunpack.i.h.bf16 %v2524_v63  ;;  %v2525_v44 = vunpack.i.l.bf16 %v2524_v63  ;;  %1015 = vadd.xlane.f32.xlu1 %v1014_v43  ;;  %v997_v14 = vsub.f32 %v3243_v0, %v989_v16  ;;  %1211 = vst.msk [vmem:[#allocation2 + $0x18] sm:$0x3] %vm1208_vm6, %v2761_v5  ;;  %1215 = vst.msk [vmem:[#allocation2 + $0x38] sm:$0x3] %vm1208_vm6, %v2761_v5  ;;  %v1571_v41 = vld [vmem:[%s3692_s3 + $0x110] sm:$0xff]  ;;  %v1572_v42 = vld [vmem:[%s3692_s3 + $0x118] sm:$0xff] }
 0x398   : > { %2674 = vpow2.f32 %v1010_v61  ;;  %1214 = vst.msk [vmem:[#allocation2 + $0x30] sm:$0xff] %vm477_vm2, %v2761_v5  ;;  %1216 = vst.msk [vmem:[#allocation2 + $0x40] sm:$0xff] %vm477_vm2, %v2761_v5  ;;  %v2332_v16 = vpack.c.bf16 %v1572_v42, %v1571_v41  ;;  %v1553_v63 = vld [vmem:[%s3692_s3 + $0x80] sm:$0xff]  ;;  %v1554_v43 = vld [vmem:[%s3692_s3 + $0x88] sm:$0xff] }
 0x399   : > { %v3261_v36 = vpop.eup %2666  ;;  %v2280_v45 = vpack.c.bf16 %v2526_v33, %v2525_v44  ;;  %v1012_v25 = vmul.f32 1.442695, %v997_v14  ;;  %1217 = vst.msk [vmem:[#allocation2 + $0x48] sm:$0x3] %vm1208_vm6, %v2761_v5  ;;  %1219 = vst.msk [vmem:[#allocation2 + $0x58] sm:$0x3] %vm1208_vm6, %v2761_v5  ;;  %v2296_v44 = vpack.c.bf16 %v1554_v43, %v1553_v63 }
 0x39a   : > { %v2529_v47 = vpop.permute.xlu0 %2528  ;;  %v1023_v48 = vsel %vm486_vm3, %v3261_v36, 0.0  ;;  %1218 = vst.msk [vmem:[#allocation2 + $0x50] sm:$0xff] %vm477_vm2, %v2761_v5  ;;  %1220 = vst.msk [vmem:[#allocation2 + $0x60] sm:$0xff] %vm477_vm2, %v2761_v5  ;;  %v1537_v33 = vld [vmem:[%s3692_s3] sm:$0xff]  ;;  %v1559_v59 = vld [vmem:[%s3692_s3 + $0xb0] sm:$0xff] }
 0x39b   : > { %v2531_v50 = vunpack.i.h.bf16 %v2529_v47  ;;  %v2530_v51 = vunpack.i.l.bf16 %v2529_v47  ;;  %1024 = vadd.xlane.f32.xlu0 %v1023_v48  ;;  %2281 = vmatprep.subr.bf16.mxu1 %v2280_v45  ;;  %2676 = vpow2.f32 %v1012_v25  ;;  %1221 = vst.msk [vmem:[#allocation2 + $0x68] sm:$0x3] %vm1208_vm6, %v2761_v5  ;;  %1223 = vst.msk [vmem:[#allocation2 + $0x78] sm:$0x3] %vm1208_vm6, %v2761_v5  ;;  %v1556_v47 = vld [vmem:[%s3692_s3 + $0x98] sm:$0xff] }
 0x39c   : > { %2283 = vmatpush3.bf16.msra.mxu1 %v2280_v45  ;;  %1222 = vst.msk [vmem:[#allocation2 + $0x70] sm:$0xff] %vm477_vm2, %v2761_v5  ;;  %1224 = vst.msk [vmem:[#allocation2 + $0x80] sm:$0xff] %vm477_vm2, %v2761_v5  ;;  %v1555_v45 = vld [vmem:[%s3692_s3 + $0x90] sm:$0xff]  ;;  %2297 = vmatprep.subr.bf16.mxu0 %v2296_v44  ;;  %v1560_v61 = vld [vmem:[%s3692_s3 + $0xb8] sm:$0xff] }
 0x39d   : > { %v2669_v52 = vpop.eup %2668  ;;  %v2284_v53 = vpack.c.bf16 %v2531_v50, %v2530_v51  ;;  %1225 = vst.msk [vmem:[#allocation2 + $0x88] sm:$0x3] %vm1208_vm6, %v2761_v5  ;;  %1227 = vst.msk [vmem:[#allocation2 + $0x98] sm:$0x3] %vm1208_vm6, %v2761_v5  ;;  %v2300_v50 = vpack.c.bf16 %v1556_v47, %v1555_v45  ;;  %v1539_v51 = vld [vmem:[%s3692_s3 + $0x10] sm:$0xff]  ;;  %v2308_v25 = vpack.c.bf16 %v1560_v61, %v1559_v59 }
 0x39e   : > { %v2671_v55 = vpop.eup %2670  ;;  %v1020_v56 = vsel %vm486_vm3, %v2669_v52, 0.0  ;;  %1226 = vst.msk [vmem:[#allocation2 + $0x90] sm:$0xff] %vm477_vm2, %v2761_v5  ;;  %v1552_v5 = vld [vmem:[%s3692_s3 + $0x78] sm:$0xff] }
 0x39f   : > { %v1026_v57 = vsel %vm486_vm3, %v2671_v55, 0.0  ;;  %1021 = vadd.xlane.f32.xlu1 %v1020_v56  ;;  %2285 = vmatprep.subr.bf16.mxu1 %v2284_v53 }
 0x3a0   : > { %1027 = vadd.xlane.f32.xlu0 %v1026_v57  ;;  %2287 = vmatpush3.bf16.msra.mxu1 %v2284_v53  ;;  %v1557_v53 = vld [vmem:[%s3692_s3 + $0xa0] sm:$0xff] }
 0x3a1   : > { %v2673_v34 = vpop.eup %2672 }
 0x3a2   : > { %v1029_v58 = vsel %vm486_vm3, %v2673_v34, 0.0  ;;  %v2675_v60 = vpop.eup %2674 }
 0x3a3   : > { %1030 = vadd.xlane.f32.xlu1 %v1029_v58  ;;  %v1032_v62 = vsel %vm486_vm3, %v2675_v60, 0.0  ;;  %v1542_v58 = vld [vmem:[%s3692_s3 + $0x28] sm:$0xff] }
 0x3a5   : > { %v2677_v1 = vpop.eup %2676 }
 0x3a6   : > { %v1035_v2 = vsel %vm486_vm3, %v2677_v1, 0.0 }
 0x3b4   : > { %2538 = vrot.lane.b32.xlu1 %v3203_v46, %s2760_s26 }
 0x3b6   : > { %2533 = vrot.lane.b32.xlu0 %v3199_v40, %s2760_s26 }
 0x3d5   : > { %1033 = vadd.xlane.f32.xlu0 %v1032_v62  ;;  %v1544_v62 = vld [vmem:[%s3692_s3 + $0x38] sm:$0xff] }
 0x3d9   : > { %1036 = vadd.xlane.f32.xlu0 %v1035_v2  ;;  %v1562_v2 = vld [vmem:[%s3692_s3 + $0xc8] sm:$0xff] }
 0x423   : > { %v1019_v46 = vpop.xlane.xlu0 %1018 }
 0x424   : > { %v1016_v4 = vpop.xlane.xlu1 %1015 }
 0x425   : > { %2678 = vrcp.f32 %v1016_v4 }
 0x426   : > { %2680 = vrcp.f32 %v1019_v46 }
 0x428   : > { %v1025_v40 = vpop.xlane.xlu0 %1024 }
 0x42c   : > { %v1022_v6 = vpop.xlane.xlu1 %1021 }
 0x42d   : > { %v1028_v7 = vpop.xlane.xlu0 %1027  ;;  %2682 = vrcp.f32 %v1022_v6  ;;  %v1546_v6 = vld [vmem:[%s3692_s3 + $0x48] sm:$0xff] }
 0x42e   : > { %2684 = vrcp.f32 %v1025_v40  ;;  %v1545_v40 = vld [vmem:[%s3692_s3 + $0x40] sm:$0xff] }
 0x42f   : > { %v2679_v8 = vpop.eup %2678  ;;  %2686 = vrcp.f32 %v1028_v7  ;;  %v1563_v7 = vld [vmem:[%s3692_s3 + $0xd0] sm:$0xff] }
 0x430   : > { %v1031_v9 = vpop.xlane.xlu1 %1030  ;;  %v1046_v11 = vmul.f32 %v2679_v8, %v2665_v39  ;;  %v2681_v20 = vpop.eup %2680  ;;  %v1564_v8 = vld [vmem:[%s3692_s3 + $0xd8] sm:$0xff] }
 0x431   : > { %v2534_v12 = vpop.permute.xlu0 %2533  ;;  %2688 = vrcp.f32 %v1031_v9  ;;  %v1047_v22 = vmul.f32 %v2681_v20, %v3256_v38  ;;  %v1570_v38 = vld [vmem:[%s3692_s3 + $0x108] sm:$0xff]  ;;  %v2314_v9 = vpack.c.bf16 %v1546_v6, %v1545_v40 }
 0x432   : > { %v2536_v37 = vunpack.i.h.bf16 %v2534_v12  ;;  %v2535_v54 = vunpack.i.l.bf16 %v2534_v12  ;;  %2184 = vmatprep.mubr.msk.f32.mxu1 %vm486_vm3, %v1046_v11  ;;  %v2328_v39 = vpack.c.bf16 %v1570_v38, %v1569_v35  ;;  %v2316_v11 = vpack.c.bf16 %v1564_v8, %v1563_v7  ;;  %v1547_v12 = vld [vmem:[%s3692_s3 + $0x50] sm:$0xff] }
 0x434   : > { %v2288_v0 = vpack.c.bf16 %v2536_v37, %v2535_v54  ;;  %v2539_v30 = vpop.permute.xlu1 %2538  ;;  %v1548_v37 = vld [vmem:[%s3692_s3 + $0x58] sm:$0xff] }
 0x435   : > { %v2541_v17 = vunpack.i.h.bf16 %v2539_v30  ;;  %v2540_v18 = vunpack.i.l.bf16 %v2539_v30  ;;  %v2318_v54 = vpack.c.bf16 %v1548_v37, %v1547_v12  ;;  %v1566_v30 = vld [vmem:[%s3692_s3 + $0xe8] sm:$0xff] }
 0x436   : > { %2289 = vmatprep.subr.bf16.mxu1 %v2288_v0 }
 0x437   : > { %v2292_v19 = vpack.c.bf16 %v2541_v17, %v2540_v18  ;;  %2291 = vmatpush3.bf16.msra.mxu1 %v2288_v0  ;;  %v2683_v21 = vpop.eup %2682  ;;  %v1565_v0 = vld [vmem:[%s3692_s3 + $0xe0] sm:$0xff] }
 0x438   : > { %v2685_v24 = vpop.eup %2684  ;;  %v1048_v26 = vmul.f32 %v2683_v21, %v2669_v52  ;;  %v1540_v52 = vld [vmem:[%s3692_s3 + $0x18] sm:$0xff]  ;;  %v1549_v17 = vld [vmem:[%s3692_s3 + $0x60] sm:$0xff]  ;;  %v2320_v20 = vpack.c.bf16 %v1566_v30, %v1565_v0  ;;  %v1550_v21 = vld [vmem:[%s3692_s3 + $0x68] sm:$0xff] }
 0x439   : > { %2293 = vmatprep.subr.bf16.mxu1 %v2292_v19  ;;  %v2687_v27 = vpop.eup %2686  ;;  %v1049_v49 = vmul.f32 %v2685_v24, %v3261_v36  ;;  %v1538_v36 = vld [vmem:[%s3692_s3 + $0x8] sm:$0xff]  ;;  %v2302_v56 = vpack.c.bf16 %v1540_v52, %v1539_v51  ;;  %v3399_v18 = vld [vmem:[#allocation2] sm:$0xff]  ;;  %v2322_v24 = vpack.c.bf16 %v1550_v21, %v1549_v17 }
 0x43a   : > { %v1050_v3 = vmul.f32 %v2687_v27, %v2671_v55  ;;  %v2298_v48 = vpack.c.bf16 %v1538_v36, %v1537_v33  ;;  %v1558_v55 = vld [vmem:[%s3692_s3 + $0xa8] sm:$0xff]  ;;  %v1321_v27 = vrot.slane %v3399_v18, 2 }
 0x43b   : > { %2295 = vmatpush3.bf16.msra.mxu1 %v2292_v19  ;;  %v2689_v23 = vpop.eup %2688  ;;  %v2304_v57 = vpack.c.bf16 %v1558_v55, %v1557_v53  ;;  %v1238_v19 = vld [vmem:[#allocation2 + $0x8] sm:$0x3] }
 0x43c   : > { %v1051_v10 = vmul.f32 %v2689_v23, %v2673_v34  ;;  %2329 = vmatprep.subr.bf16.mxu1 %v2328_v39  ;;  %2299 = vmatpush3.bf16.msra.mxu0 %v2298_v48  ;;  %v1541_v34 = vld [vmem:[%s3692_s3 + $0x20] sm:$0xff] }
 0x43d   : > { %2301 = vmatprep.subr.bf16.mxu0 %v2300_v50  ;;  %v2306_v14 = vpack.c.bf16 %v1542_v58, %v1541_v34 }
 0x43e   : > { %2185 = vmatmul.mubr.msk.f32.vlgmr.msra.gmra.mrb[16].mxu1 %vm486_vm3, %v1047_v22 }
 0x43f   : > { %2187 = vmatprep.mubr.msk.f32.mxu1 %vm486_vm3, %v1048_v26  ;;  %2331 = vmatpush3.bf16.msra.mxu1 %v2328_v39 }
 0x440   : > { %2333 = vmatprep.subr.bf16.mxu1 %v2332_v16  ;;  %2303 = vmatpush3.bf16.msra.mxu0 %v2302_v56 }
 0x441   : > { %2305 = vmatprep.subr.bf16.mxu0 %v2304_v57 }
 0x442   : > { %2188 = vmatmul.mubr.msk.f32.gmra.mrb[18].mxu1 %vm486_vm3, %v1049_v49  ;;  %v1322_v49 = vrot.slane %v1238_v19, 2 }
 0x443   : > { %2190 = vmatprep.mubr.msk.f32.mxu1 %vm486_vm3, %v1050_v3  ;;  %2335 = vmatpush3.bf16.msra.mxu1 %v2332_v16 }
 0x444   : > { %2307 = vmatpush3.bf16.msra.mxu0 %v2306_v14 }
 0x445   : > { %2309 = vmatprep.subr.bf16.mxu0 %v2308_v25 }
 0x446   : > { %2191 = vmatmul.mubr.msk.f32.gmra.mrb[20].mxu1 %vm486_vm3, %v1051_v10  ;;  %v1567_v10 = vld [vmem:[%s3692_s3 + $0xf0] sm:$0xff] }
 0x462   : > { %v1034_v28 = vpop.xlane.xlu0 %1033 }
 0x463   : > { %2690 = vrcp.f32 %v1034_v28  ;;  %v1568_v28 = vld [vmem:[%s3692_s3 + $0xf8] sm:$0xff] }
 0x466   : > { %v1037_v15 = vpop.xlane.xlu0 %1036 }
 0x467   : > { %2692 = vrcp.f32 %v1037_v15  ;;  %v1551_v15 = vld [vmem:[%s3692_s3 + $0x70] sm:$0xff] }
 0x468   : > { %v2326_v35 = vpack.c.bf16 %v1552_v5, %v1551_v15 }
 0x46d   : > { %v2691_v29 = vpop.eup %2690 }
 0x46e   : > { %v1052_v13 = vmul.f32 %v2691_v29, %v2675_v60  ;;  %v1543_v60 = vld [vmem:[%s3692_s3 + $0x30] sm:$0xff]  ;;  %v1323_v29 = vsel %vm308_vm1, %v1321_v27, %v1322_v49 }
 0x46f   : > { %v2310_v46 = vpack.c.bf16 %v1544_v62, %v1543_v60 }
 0x470   : > { %2193 = vmatprep.mubr.msk.f32.mxu1 %vm486_vm3, %v1052_v13  ;;  %v1273_v13 = vrot.slane %v3399_v18, 1 }
 0x471   : > { %v2693_v31 = vpop.eup %2692  ;;  %2311 = vmatpush3.bf16.msra.mxu0 %v2310_v46 }
 0x472   : > { %v1053_v32 = vmul.f32 %v2693_v31, %v2677_v1  ;;  %v1561_v1 = vld [vmem:[%s3692_s3 + $0xc0] sm:$0xff]  ;;  %v1274_v31 = vrot.slane %v1238_v19, 1 }
 0x473   : > { %v2312_v4 = vpack.c.bf16 %v1562_v2, %v1561_v1 }
 0x474   : > { %2194 = vmatmul.mubr.msk.f32.gmra.mrb[22].mxu1 %vm486_vm3, %v1053_v32  ;;  %v2324_v32 = vpack.c.bf16 %v1568_v28, %v1567_v10  ;;  %v1275_v47 = vsel %vm259_vm0, %v1273_v13, %v1274_v31 }
 0x475   : > { %2313 = vmatprep.subr.bf16.mxu0 %v2312_v4 }
 0x476   : > { %2315 = vmatpush3.bf16.msra.mxu0 %v2314_v9 }
 0x477   : > { %2317 = vmatprep.subr.bf16.mxu0 %v2316_v11 }
 0x47a   : > { %2319 = vmatpush3.bf16.msra.mxu0 %v2318_v54 }
 0x47b   : > { %2321 = vmatprep.subr.bf16.mxu0 %v2320_v20 }
 0x47e   : > { %2323 = vmatpush3.bf16.msra.mxu0 %v2322_v24 }
 0x47f   : > { %2325 = vmatprep.subr.bf16.mxu0 %v2324_v32 }
 0x482   : > { %2327 = vmatpush3.bf16.msra.mxu0 %v2326_v35 }
 0x511   : > { %v2186_v22 = vpop.f32.mrb[16].mxu1 }
 0x512   : > { %1230 = vst.msk [vmem:[#allocation2 + $0x21] sm:$0xff] %vm477_vm2, %v2186_v22  ;;  %v1168_v26 = vpop.f32.mrb[17].mxu1 }
 0x513   : > { %1229 = vst.msk [vmem:[#allocation2 + $0x11] sm:$0xff] %vm477_vm2, %v1168_v26 }
 0x515   : > { %v2189_v23 = vpop.f32.mrb[18].mxu1 }
 0x516   : > { %1232 = vst.msk [vmem:[#allocation2 + $0x41] sm:$0xff] %vm477_vm2, %v2189_v23  ;;  %v1178_v3 = vpop.f32.mrb[19].mxu1 }
 0x517   : > { %1231 = vst.msk [vmem:[#allocation2 + $0x31] sm:$0xff] %vm477_vm2, %v1178_v3 }
 0x519   : > { %v2192_v38 = vpop.f32.mrb[20].mxu1  ;;  %v3423_v39 = vld [vmem:[#allocation2 + $0x20] sm:$0xff]  ;;  %v1242_v41 = vld [vmem:[#allocation2 + $0x28] sm:$0x3] }
 0x51a   : > { %1234 = vst.msk [vmem:[#allocation2 + $0x61] sm:$0xff] %vm477_vm2, %v2192_v38  ;;  %v1188_v42 = vpop.f32.mrb[21].mxu1  ;;  %v2542_v16 = vpack.i.bf16 %v1323_v29, %v3423_v39  ;;  %v1280_v63 = vrot.slane %v1242_v41, 1  ;;  %v1327_v43 = vrot.slane %v3423_v39, 2  ;;  %v1328_v33 = vrot.slane %v1242_v41, 2  ;;  %v3428_v44 = vld [vmem:[#allocation2 + $0x10] sm:$0xff] }
 0x51b   : > { %1233 = vst.msk [vmem:[#allocation2 + $0x51] sm:$0xff] %vm477_vm2, %v1188_v42  ;;  %v1279_v36 = vrot.slane %v3423_v39, 1  ;;  %v1240_v45 = vld [vmem:[#allocation2 + $0x18] sm:$0x3]  ;;  %v1324_v48 = vrot.slane %v3428_v44, 2  ;;  %v1276_v52 = vrot.slane %v3428_v44, 1 }
 0x51c   : > { %2543 = vrot.lane.b32.xlu1 %v2542_v16, %s2760_s26  ;;  %v1329_v50 = vsel %vm308_vm1, %v1327_v43, %v1328_v33  ;;  %v1325_v51 = vrot.slane %v1240_v45, 2  ;;  %v1277_v53 = vrot.slane %v1240_v45, 1 }
 0x51d   : > { %2204 = vmatprep.mubr.msk.f32.mxu1 %vm477_vm2, %v1329_v50  ;;  %v3439_v55 = vsel %vm259_vm0, %v1279_v36, %v1280_v63  ;;  %v3441_v56 = vld [vmem:[#allocation2 + $0x40] sm:$0xff]  ;;  %v1246_v57 = vld [vmem:[#allocation2 + $0x48] sm:$0x3] }
 0x51e   : > { %v2547_v34 = vpack.i.bf16 %v3428_v44, %v3439_v55  ;;  %v1326_v58 = vsel %vm308_vm1, %v1324_v48, %v1325_v51  ;;  %v3446_v59 = vld [vmem:[#allocation2 + $0x30] sm:$0xff]  ;;  %v1244_v61 = vld [vmem:[#allocation2 + $0x38] sm:$0x3]  ;;  %v1286_v14 = vrot.slane %v1246_v57, 1  ;;  %v1333_v25 = vrot.slane %v3441_v56, 2 }
 0x51f   : > { %v2552_v60 = vpack.i.bf16 %v1275_v47, %v1326_v58  ;;  %v1330_v62 = vrot.slane %v3446_v59, 2  ;;  %v1331_v1 = vrot.slane %v1244_v61, 2  ;;  %v1334_v2 = vrot.slane %v1246_v57, 2 }
 0x520   : > { %2548 = vrot.lane.b32.xlu1 %v2547_v34, %s2759_s15  ;;  %v3452_v46 = vsel %vm259_vm0, %v1276_v52, %v1277_v53  ;;  %v1285_v4 = vrot.slane %v3441_v56, 1  ;;  %v2562_v22 = vpack.i.bf16 %v1329_v50, %v3441_v56  ;;  %v1282_v26 = vrot.slane %v3446_v59, 1 }
 0x521   : > { %2553 = vrot.lane.b32.xlu0 %v2552_v60, %s2758_s25  ;;  %v1332_v40 = vsel %vm308_vm1, %v1330_v62, %v1331_v1  ;;  %v1335_v6 = vsel %vm308_vm1, %v1333_v25, %v1334_v2  ;;  %v3458_v7 = vld [vmem:[#allocation2 + $0x60] sm:$0xff]  ;;  %v1250_v8 = vld [vmem:[#allocation2 + $0x68] sm:$0x3]  ;;  %v2557_v9 = vpack.i.bf16 %v3452_v46, %v1329_v50  ;;  %v1283_v27 = vrot.slane %v1244_v61, 1  ;;  %v1255_v25 = vld [vmem:[#allocation2 + $0x90] sm:$0xff] }
 0x522   : > { %2205 = vmatmul.mubr.msk.f32.vlgmr.msra.gmra.mrb[24].mxu1 %vm477_vm2, %v1332_v40  ;;  %v3463_v11 = vsel %vm259_vm0, %v1285_v4, %v1286_v14  ;;  %v3465_v12 = vld [vmem:[#allocation2 + $0x50] sm:$0xff]  ;;  %v1248_v37 = vld [vmem:[#allocation2 + $0x58] sm:$0x3]  ;;  %v1339_v54 = vrot.slane %v3458_v7, 2  ;;  %v1340_v0 = vrot.slane %v1250_v8, 2  ;;  %v2582_v24 = vpack.i.bf16 %v3439_v55, %v1332_v40 }
 0x523   : > { %2207 = vmatprep.mubr.msk.f32.mxu1 %vm477_vm2, %v1335_v6  ;;  %v2572_v30 = vpack.i.bf16 %v3446_v59, %v3463_v11  ;;  %v1336_v17 = vrot.slane %v3465_v12, 2  ;;  %v1337_v19 = vrot.slane %v1248_v37, 2  ;;  %v1292_v49 = vrot.slane %v1250_v8, 1  ;;  %v1256_v62 = vld [vmem:[#allocation2 + $0x98] sm:$0x3] }
 0x524   : > { %2558 = vrot.lane.b32.xlu1 %v2557_v9, %s2758_s25  ;;  %v1341_v21 = vsel %vm308_vm1, %v1339_v54, %v1340_v0  ;;  %v1291_v23 = vrot.slane %v3458_v7, 1  ;;  %v2567_v3 = vpack.i.bf16 %v1326_v58, %v3446_v59  ;;  %v2597_v10 = vpack.i.bf16 %v1332_v40, %v3465_v12 }
 0x525   : > { %2573 = vrot.lane.b32.xlu0 %v2572_v30, %s2759_s15  ;;  %v1338_v20 = vsel %vm308_vm1, %v1336_v17, %v1337_v19  ;;  %v3487_v28 = vsel %vm259_vm0, %v1282_v26, %v1283_v27  ;;  %v1289_v32 = vrot.slane %v1248_v37, 1  ;;  %v1288_v35 = vrot.slane %v3465_v12, 1 }
 0x526   : > { %2208 = vmatmul.mubr.msk.f32.gmra.mrb[26].mxu1 %vm477_vm2, %v1338_v20  ;;  %v3491_v15 = vsel %vm259_vm0, %v1291_v23, %v1292_v49  ;;  %v2577_v29 = vpack.i.bf16 %v3423_v39, %v3487_v28  ;;  %v2587_v31 = vpack.i.bf16 %v3487_v28, %v1335_v6  ;;  %v2612_v5 = vpack.i.bf16 %v3463_v11, %v1338_v20 }
 0x527   : > { %2210 = vmatprep.mubr.msk.f32.mxu1 %vm477_vm2, %v1341_v21  ;;  %v2602_v13 = vpack.i.bf16 %v3465_v12, %v3491_v15  ;;  %v2592_v38 = vpack.i.bf16 %v1335_v6, %v3458_v7  ;;  %v3507_v41 = vsel %vm259_vm0, %v1288_v35, %v1289_v32  ;;  %v1459_v6 = vrot.slane %v1255_v25, 1 }
 0x528   : > { %2563 = vrot.lane.b32.xlu1 %v2562_v22, %s2760_s26  ;;  %v2607_v42 = vpack.i.bf16 %v3441_v56, %v3507_v41  ;;  %v2617_v16 = vpack.i.bf16 %v3507_v41, %v1341_v21  ;;  %v1460_v9 = vrot.slane %v1256_v62, 1  ;;  %v1486_v37 = vrot.slane %v1255_v25, 2 }
 0x529   : > { %2583 = vrot.lane.b32.xlu0 %v2582_v24, %s2758_s25  ;;  %v1487_v54 = vrot.slane %v1256_v62, 2 }
 0x52a   : > { %v1461_v19 = vsel %vm259_vm0, %v1459_v6, %v1460_v9 }
 0x52b   : > { %v1488_v0 = vsel %vm308_vm1, %v1486_v37, %v1487_v54 }
 0x52c   : > { %2568 = vrot.lane.b32.xlu1 %v2567_v3, %s2760_s26 }
 0x52d   : > { %2598 = vrot.lane.b32.xlu0 %v2597_v10, %s2760_s26 }
 0x530   : > { %2578 = vrot.lane.b32.xlu1 %v2577_v29, %s2759_s15 }
 0x531   : > { %2603 = vrot.lane.b32.xlu0 %v2602_v13, %s2759_s15 }
 0x534   : > { %2588 = vrot.lane.b32.xlu1 %v2587_v31, %s2758_s25 }
 0x535   : > { %2613 = vrot.lane.b32.xlu0 %v2612_v5, %s2758_s25 }
 0x538   : > { %2593 = vrot.lane.b32.xlu1 %v2592_v38, %s2760_s26 }
 0x53c   : > { %2608 = vrot.lane.b32.xlu1 %v2607_v42, %s2759_s15 }
 0x540   : > { %2618 = vrot.lane.b32.xlu1 %v2617_v16, %s2758_s25 }
 0x547   : > { %v2195_v63 = vpop.f32.mrb[22].mxu1 }
 0x548   : > { %1236 = vst.msk [vmem:[#allocation2 + $0x81] sm:$0xff] %vm477_vm2, %v2195_v63  ;;  %v1198_v43 = vpop.f32.mrb[23].mxu1 }
 0x549   : > { %1235 = vst.msk [vmem:[#allocation2 + $0x71] sm:$0xff] %vm477_vm2, %v1198_v43 }
 0x54f   : > { %v1253_v33 = vld [vmem:[#allocation2 + $0x80] sm:$0xff]  ;;  %v1254_v36 = vld [vmem:[#allocation2 + $0x88] sm:$0x3] }
 0x550   : > { %v2622_v45 = vpack.i.bf16 %v1341_v21, %v1253_v33  ;;  %v3517_v47 = vld [vmem:[#allocation2 + $0x70] sm:$0xff]  ;;  %v1252_v48 = vld [vmem:[#allocation2 + $0x78] sm:$0x3]  ;;  %v1406_v50 = vrot.slane %v1253_v33, 2  ;;  %v1407_v51 = vrot.slane %v1254_v36, 2  ;;  %v1395_v61 = vrot.slane %v1253_v33, 1 }
 0x551   : > { %v2627_v52 = vpack.i.bf16 %v1338_v20, %v3517_v47  ;;  %v1295_v53 = vrot.slane %v1252_v48, 1  ;;  %v1342_v57 = vrot.slane %v3517_v47, 2  ;;  %v1343_v34 = vrot.slane %v1252_v48, 2 }
 0x552   : > { %2623 = vrot.lane.b32.xlu1 %v2622_v45, %s2760_s26  ;;  %v1294_v58 = vrot.slane %v3517_v47, 1  ;;  %v1396_v14 = vrot.slane %v1254_v36, 1  ;;  %v1408_v1 = vsel %vm308_vm1, %v1406_v50, %v1407_v51  ;;  %v2657_v20 = vpack.i.bf16 %v1253_v33, %v1461_v19 }
 0x553   : > { %2628 = vrot.lane.b32.xlu0 %v2627_v52, %s2760_s26  ;;  %v1344_v60 = vsel %vm308_vm1, %v1342_v57, %v1343_v34 }
 0x554   : > { %2211 = vmatmul.mubr.msk.f32.gmra.mrb[28].mxu1 %vm477_vm2, %v1344_v60  ;;  %v3528_v2 = vsel %vm259_vm0, %v1294_v58, %v1295_v53  ;;  %v2637_v4 = vpack.i.bf16 %v3491_v15, %v1344_v60  ;;  %v3535_v8 = vsel %vm259_vm0, %v1395_v61, %v1396_v14  ;;  %v2652_v21 = vpack.i.bf16 %v1344_v60, %v1255_v25 }
 0x555   : > { %2213 = vmatprep.mubr.msk.f32.mxu1 %vm477_vm2, %v1408_v1  ;;  %v2632_v40 = vpack.i.bf16 %v3458_v7, %v3528_v2  ;;  %v2647_v30 = vpack.i.bf16 %v3528_v2, %v1408_v1  ;;  %v2642_v17 = vpack.i.bf16 %v3517_v47, %v3535_v8 }
 0x557   : > { %2633 = vrot.lane.b32.xlu1 %v2632_v40, %s2759_s15  ;;  %2638 = vrot.lane.b32.xlu0 %v2637_v4, %s2758_s25 }
 0x558   : > { %2214 = vmatmul.mubr.msk.f32.gmra.mrb[30].mxu1 %vm477_vm2, %v1488_v0 }
 0x55b   : > { %2648 = vrot.lane.b32.xlu1 %v2647_v30, %s2758_s25  ;;  %2643 = vrot.lane.b32.xlu0 %v2642_v17, %s2759_s15  ;;  %s215_s25 = sand.u32 1, %s2748_s19  }
 0x55c   : > { %s1902_s11 = sshll.u32 %s215_s25, 6  ;;  %s3648_s17 = scalar_lea.sflag [#allocation4], %s215_s25 }
 0x55d   : > { %s3619_s12 = scalar_lea.vmem [#allocation3], %s1902_s11 }
 0x55e   : > { %s1836_s14 = sshll.u32 %s3619_s12, 4  ;;  %s3642_s14 = int_to_ptr.vmem [resolvable:$true] %s1836_s14 }
 0x55f   : > { %2658 = vrot.lane.b32.xlu1 %v2657_v20, %s2759_s15  ;;  %2653 = vrot.lane.b32.xlu0 %v2652_v21, %s2760_s26  ;;  %s2694_s22 = scalar_lea.vmem %s3642_s14, 1024  ;;  %p2701_p0 = scmp.lt.s32.totalorder %s3642_s14, %s2699_s30 }
 0x560   : > { %p2695_p11 = scmp.ne.s32.totalorder %s3642_s14, %s2694_s22  ;;  %p2702_p1 = scmp.lt.s32.totalorder %s2700_s6, %s2694_s22 }
 0x562   : > { %p2696_p12 = pnand %p2695_p11, %p2833_p5  ;;  %p2703_p2 = por %p2702_p1, %p2701_p0 }
 0x564   : > { %p2697_p13 = pneg %p2696_p12 }
 0x566   : > { %p2704_p3 = pnand %p2703_p2, %p2697_p13 }
 0x58e   : > { %v2544_v22 = vpop.permute.xlu1 %2543 }
 0x58f   : > { %v2546_v23 = vunpack.i.h.bf16 %v2544_v22  ;;  %v2545_v3 = vunpack.i.l.bf16 %v2544_v22 }
 0x592   : > { %v2549_v24 = vpop.permute.xlu1 %2548 }
 0x593   : > { %v2554_v26 = vpop.permute.xlu0 %2553  ;;  %v2551_v10 = vunpack.i.h.bf16 %v2549_v24  ;;  %v2550_v29 = vunpack.i.l.bf16 %v2549_v24 }
 0x594   : > { %v2556_v27 = vunpack.i.h.bf16 %v2554_v26  ;;  %v2555_v49 = vunpack.i.l.bf16 %v2554_v26 }
 0x596   : > { %v1489_v13 = vsel %vm477_vm2, %v3399_v18, %v2556_v27  ;;  %v2559_v31 = vpop.permute.xlu1 %2558  ;;  %v1513_v32 = vsel %vm477_vm2, %v3452_v46, %v2555_v49 }
 0x597   : > { %v2574_v5 = vpop.permute.xlu0 %2573  ;;  %v1521_v35 = vsel %vm486_vm3, %v1513_v32, %v2545_v3  ;;  %v1497_v38 = vsel %vm486_vm3, %v1489_v13, %v2546_v23  ;;  %v2560_v36 = vunpack.i.l.bf16 %v2559_v31  ;;  %v2561_v45 = vunpack.i.h.bf16 %v2559_v31 }
 0x598   : > { %v1529_v42 = vsel %vm495_vm4, %v1521_v35, %v2550_v29  ;;  %v1505_v16 = vsel %vm495_vm4, %v1497_v38, %v2551_v10  ;;  %v2575_v40 = vunpack.i.l.bf16 %v2574_v5  ;;  %v2576_v54 = vunpack.i.h.bf16 %v2574_v5 }
 0x599   : > { %1660 = vmatprep.mubr.f32.mxu0 %v1529_v42  ;;  %v1514_v34 = vsel %vm477_vm2, %v3439_v55, %v2560_v36  ;;  %v1490_v60 = vsel %vm477_vm2, %v3428_v44, %v2561_v45 }
 0x59a   : > { %1661 = vmatmul.mubr.f32.vlgmr.msra.gmra.mrb[16].mxu0 %v1505_v16  ;;  %v2564_v63 = vpop.permute.xlu1 %2563 }
 0x59b   : > { %v2584_v43 = vpop.permute.xlu0 %2583  ;;  %v2565_v50 = vunpack.i.l.bf16 %v2564_v63  ;;  %v2566_v58 = vunpack.i.h.bf16 %v2564_v63 }
 0x59c   : > { %v2585_v33 = vunpack.i.l.bf16 %v2584_v43  ;;  %v2586_v46 = vunpack.i.h.bf16 %v2584_v43 }
 0x59e   : > { %v2569_v18 = vpop.permute.xlu1 %2568  ;;  %v1515_v53 = vsel %vm477_vm2, %v3487_v28, %v2585_v33  ;;  %v1491_v28 = vsel %vm477_vm2, %v3423_v39, %v2586_v46 }
 0x59f   : > { %v2599_v48 = vpop.permute.xlu0 %2598  ;;  %v2571_v51 = vunpack.i.h.bf16 %v2569_v18  ;;  %v2570_v52 = vunpack.i.l.bf16 %v2569_v18  ;;  %v1523_v4 = vsel %vm486_vm3, %v1515_v53, %v2565_v50  ;;  %v1499_v44 = vsel %vm486_vm3, %v1491_v28, %v2566_v58 }
 0x5a0   : > { %v1531_v37 = vsel %vm495_vm4, %v1523_v4, %v2575_v40  ;;  %v1507_v39 = vsel %vm495_vm4, %v1499_v44, %v2576_v54  ;;  %v2601_v26 = vunpack.i.h.bf16 %v2599_v48  ;;  %v2600_v27 = vunpack.i.l.bf16 %v2599_v48 }
 0x5a1   : > { %v1522_v62 = vsel %vm486_vm3, %v1514_v34, %v2570_v52  ;;  %v1498_v1 = vsel %vm486_vm3, %v1490_v60, %v2571_v51 }
 0x5a2   : > { %v2579_v57 = vpop.permute.xlu1 %2578 }
 0x5a3   : > { %v2581_v61 = vunpack.i.h.bf16 %v2579_v57  ;;  %v2580_v14 = vunpack.i.l.bf16 %v2579_v57  ;;  %v2604_v25 = vpop.permute.xlu0 %2603 }
 0x5a4   : > { %v2606_v16 = vunpack.i.h.bf16 %v2604_v25 }
 0x5a5   : > { %v1530_v6 = vsel %vm495_vm4, %v1522_v62, %v2580_v14  ;;  %v1506_v55 = vsel %vm495_vm4, %v1498_v1, %v2581_v61 }
 0x5a6   : > { %v2589_v9 = vpop.permute.xlu1 %2588  ;;  %1665 = vmatprep.mubr.f32.mxu0 %v1530_v6 }
 0x5a7   : > { %1666 = vmatmul.mubr.f32.gmra.mrb[18].mxu0 %v1506_v55  ;;  %v2614_v0 = vpop.permute.xlu0 %2613  ;;  %v2591_v30 = vunpack.i.h.bf16 %v2589_v9  ;;  %v2590_v17 = vunpack.i.l.bf16 %v2589_v9 }
 0x5a8   : > { %1670 = vmatprep.mubr.f32.mxu0 %v1531_v37  ;;  %v2615_v20 = vunpack.i.l.bf16 %v2614_v0  ;;  %v2616_v49 = vunpack.i.h.bf16 %v2614_v0 }
 0x5a9   : > { %v1516_v22 = vsel %vm477_vm2, %v3463_v11, %v2590_v17  ;;  %v1492_v24 = vsel %vm477_vm2, %v3446_v59, %v2591_v30  ;;  %v2605_v11 = vunpack.i.l.bf16 %v2604_v25 }
 0x5aa   : > { %v2594_v19 = vpop.permute.xlu1 %2593  ;;  %v1517_v13 = vsel %vm477_vm2, %v3507_v41, %v2615_v20  ;;  %v1524_v31 = vsel %vm486_vm3, %v1516_v22, %v2600_v27  ;;  %v1500_v32 = vsel %vm486_vm3, %v1492_v24, %v2601_v26  ;;  %v1493_v38 = vsel %vm477_vm2, %v3441_v56, %v2616_v49 }
 0x5ab   : > { %1671 = vmatmul.mubr.f32.gmra.mrb[20].mxu0 %v1507_v39  ;;  %v2595_v21 = vunpack.i.l.bf16 %v2594_v19  ;;  %v2596_v3 = vunpack.i.h.bf16 %v2594_v19 }
 0x5ad   : > { %v1525_v5 = vsel %vm486_vm3, %v1517_v13, %v2595_v21  ;;  %v1501_v41 = vsel %vm486_vm3, %v1493_v38, %v2596_v3 }
 0x5ae   : > { %v2609_v23 = vpop.permute.xlu1 %2608  ;;  %v1533_v42 = vsel %vm495_vm4, %v1525_v5, %v2605_v11  ;;  %v1509_v63 = vsel %vm495_vm4, %v1501_v41, %v2606_v16 }
 0x5af   : > { %v2611_v10 = vunpack.i.h.bf16 %v2609_v23  ;;  %v2610_v29 = vunpack.i.l.bf16 %v2609_v23 }
 0x5b1   : > { %v1532_v35 = vsel %vm495_vm4, %v1524_v31, %v2610_v29  ;;  %v1508_v59 = vsel %vm495_vm4, %v1500_v32, %v2611_v10  ;;  %v1937_v32 = vld [vmem:[%s3693_s4] ss:$0 sm:$0xff] }
 0x5b2   : > { %1675 = vmatprep.mubr.f32.mxu0 %v1532_v35  ;;  %v2619_v43 = vpop.permute.xlu1 %2618 }
 0x5b3   : > { %1676 = vmatmul.mubr.f32.gmra.mrb[22].mxu0 %v1508_v59  ;;  %v2621_v36 = vunpack.i.h.bf16 %v2619_v43  ;;  %v2620_v18 = vunpack.i.l.bf16 %v2619_v43 }
 0x5b4   : > { %1680 = vmatprep.mubr.f32.mxu0 %v1533_v42 }
 0x5b5   : > { %v1518_v56 = vsel %vm477_vm2, %v3491_v15, %v2620_v18  ;;  %v1494_v52 = vsel %vm477_vm2, %v3465_v12, %v2621_v36 }
 0x5b7   : > { %1681 = vmatmul.mubr.f32.gmra.mrb[24].mxu0 %v1509_v63 }
 0x5c4   : > { %v2624_v33 = vpop.permute.xlu1 %2623 }
 0x5c5   : > { %v2629_v45 = vpop.permute.xlu0 %2628  ;;  %v2626_v1 = vunpack.i.h.bf16 %v2624_v33  ;;  %v2625_v12 = vunpack.i.l.bf16 %v2624_v33 }
 0x5c6   : > { %v2631_v48 = vunpack.i.h.bf16 %v2629_v45  ;;  %v2630_v50 = vunpack.i.l.bf16 %v2629_v45 }
 0x5c8   : > { %v1526_v61 = vsel %vm486_vm3, %v1518_v56, %v2630_v50  ;;  %v1502_v14 = vsel %vm486_vm3, %v1494_v52, %v2631_v48 }
 0x5c9   : > { %v2634_v46 = vpop.permute.xlu1 %2633  ;;  %v2639_v51 = vpop.permute.xlu0 %2638 }
 0x5ca   : > { %v2636_v53 = vunpack.i.h.bf16 %v2634_v46  ;;  %v2635_v57 = vunpack.i.l.bf16 %v2634_v46  ;;  %v2641_v34 = vunpack.i.h.bf16 %v2639_v51  ;;  %v2640_v58 = vunpack.i.l.bf16 %v2639_v51 }
 0x5cc   : > { %v1534_v25 = vsel %vm495_vm4, %v1526_v61, %v2635_v57  ;;  %v1510_v60 = vsel %vm495_vm4, %v1502_v14, %v2636_v53  ;;  %v1519_v62 = vsel %vm477_vm2, %v3528_v2, %v2640_v58  ;;  %v1495_v15 = vsel %vm477_vm2, %v3458_v7, %v2641_v34 }
 0x5cd   : > { %v2649_v4 = vpop.permute.xlu1 %2648  ;;  %1685 = vmatprep.mubr.f32.mxu0 %v1534_v25  ;;  %v2644_v28 = vpop.permute.xlu0 %2643  ;;  %v1527_v37 = vsel %vm486_vm3, %v1519_v62, %v2625_v12  ;;  %v1503_v44 = vsel %vm486_vm3, %v1495_v15, %v2626_v1 }
 0x5ce   : > { %v2646_v40 = vunpack.i.h.bf16 %v2644_v28  ;;  %v2645_v6 = vunpack.i.l.bf16 %v2644_v28  ;;  %1686 = vmatmul.mubr.f32.gmra.mrb[26].mxu0 %v1510_v60  ;;  %v2651_v55 = vunpack.i.h.bf16 %v2649_v4  ;;  %v2650_v9 = vunpack.i.l.bf16 %v2649_v4 }
 0x5d0   : > { %v1535_v54 = vsel %vm495_vm4, %v1527_v37, %v2645_v6  ;;  %v1511_v2 = vsel %vm495_vm4, %v1503_v44, %v2646_v40  ;;  %v1520_v20 = vsel %vm477_vm2, %v3535_v8, %v2650_v9  ;;  %v1496_v21 = vsel %vm477_vm2, %v3517_v47, %v2651_v55 }
 0x5d1   : > { %v2659_v0 = vpop.permute.xlu1 %2658  ;;  %v2654_v7 = vpop.permute.xlu0 %2653  ;;  %1690 = vmatprep.mubr.f32.mxu0 %v1535_v54 }
 0x5d2   : > { %v2656_v30 = vunpack.i.h.bf16 %v2654_v7  ;;  %v2655_v17 = vunpack.i.l.bf16 %v2654_v7  ;;  %1691 = vmatmul.mubr.f32.gmra.mrb[28].mxu0 %v1511_v2  ;;  %v2661_v19 = vunpack.i.h.bf16 %v2659_v0  ;;  %v2660_v39 = vunpack.i.l.bf16 %v2659_v0 }
 0x5d4   : > { %v1528_v22 = vsel %vm486_vm3, %v1520_v20, %v2655_v17  ;;  %v1504_v24 = vsel %vm486_vm3, %v1496_v21, %v2656_v30 }
 0x5d5   : > { %v1536_v26 = vsel %vm495_vm4, %v1528_v22, %v2660_v39  ;;  %v1512_v27 = vsel %vm495_vm4, %v1504_v24, %v2661_v19 }
 0x5d6   : > { %1695 = vmatprep.mubr.f32.mxu0 %v1536_v26 }
 0x5d7   : > { %1696 = vmatmul.mubr.f32.gmra.mrb[30].mxu0 %v1512_v27 }
 0x5f5   : > { %v2206_v49 = vpop.f32.mrb[24].mxu1 }
 0x5f6   : > { %v1767_v23 = vpop.f32.mrb[25].mxu1 }
 0x5f9   : > { %v2209_v3 = vpop.f32.mrb[26].mxu1 }
 0x5fa   : > { %v1777_v10 = vpop.f32.mrb[27].mxu1 }
 0x627   : > { %v2212_v8 = vpop.f32.mrb[28].mxu1 }
 0x628   : > { %v1787_v29 = vpop.f32.mrb[29].mxu1 }
 0x62b   : > { %v2215_v13 = vpop.f32.mrb[30].mxu1 }
 0x62c   : > { %v1797_v47 = vpop.f32.mrb[31].mxu1 }
 0x66d   : > { %v2084_v31 = vpop.f32.mrb[16].mxu0 }
 0x66e   : > { %v2085_v5 = vpop.f32.mrb[17].mxu0 }
 0x66f   : > { %v2086_v11 = vadd.f32 %v2085_v5, %v2084_v31 }
 0x671   : > { %v1663_v35 = vadd.f32 %v2086_v11, %v1937_v32 }
 0x673   : > { %v1768_v59 = vadd.f32 %v1767_v23, %v1663_v35 }
 0x675   : > { %v1806_v38 = vmax.f32 %v1768_v59, 0.0 }
 0x677   : > { %1814 = vst.msk [vmem:[%s3619_s12] sm:$0xff] %vm477_vm2, %v1806_v38 }
 0x67a   : > { %v2087_v42 = vpop.f32.mrb[18].mxu0 }
 0x67b   : > { %v2088_v41 = vpop.f32.mrb[19].mxu0 }
 0x67c   : > { %v2089_v16 = vadd.f32 %v2088_v41, %v2087_v42 }
 0x67e   : > { %v1668_v63 = vadd.f32 %v2089_v16, %v1937_v32  ;;  %v2090_v43 = vpop.f32.mrb[20].mxu0 }
 0x67f   : > { %v2091_v33 = vpop.f32.mrb[21].mxu0 }
 0x680   : > { %v1773_v36 = vadd.f32 %v2206_v49, %v1668_v63  ;;  %v2092_v18 = vadd.f32 %v2091_v33, %v2090_v43 }
 0x682   : > { %v1807_v45 = vmax.f32 %v1773_v36, 0.0  ;;  %v1673_v48 = vadd.f32 %v2092_v18, %v1937_v32 }
 0x684   : > { %1815 = vst.msk [vmem:[%s3619_s12 + $0x8] sm:$0xff] %vm477_vm2, %v1807_v45  ;;  %v1778_v50 = vadd.f32 %v1777_v10, %v1673_v48 }
 0x686   : > { %v1808_v46 = vmax.f32 %v1778_v50, 0.0  ;;  %v2093_v51 = vpop.f32.mrb[22].mxu0 }
 0x687   : > { %v2094_v56 = vpop.f32.mrb[23].mxu0 }
 0x688   : > { %1816 = vst.msk [vmem:[%s3619_s12 + $0x10] sm:$0xff] %vm477_vm2, %v1808_v46  ;;  %v2095_v52 = vadd.f32 %v2094_v56, %v2093_v51 }
 0x68a   : > { %v1678_v53 = vadd.f32 %v2095_v52, %v1937_v32  ;;  %v2096_v57 = vpop.f32.mrb[24].mxu0 }
 0x68b   : > { %v2097_v34 = vpop.f32.mrb[25].mxu0 }
 0x68c   : > { %v1783_v58 = vadd.f32 %v2209_v3, %v1678_v53  ;;  %v2098_v61 = vadd.f32 %v2097_v34, %v2096_v57 }
 0x68e   : > { %v1809_v14 = vmax.f32 %v1783_v58, 0.0  ;;  %v1683_v25 = vadd.f32 %v2098_v61, %v1937_v32 }
 0x690   : > { %1817 = vst.msk [vmem:[%s3619_s12 + $0x18] sm:$0xff] %vm477_vm2, %v1809_v14  ;;  %v1788_v60 = vadd.f32 %v1787_v29, %v1683_v25 }
 0x692   : > { %v1810_v62 = vmax.f32 %v1788_v60, 0.0 }
 0x694   : > { %1818 = vst.msk [vmem:[%s3619_s12 + $0x20] sm:$0xff] %vm477_vm2, %v1810_v62 }
 0x6a1   : > { %v2099_v15 = vpop.f32.mrb[26].mxu0 }
 0x6a2   : > { %v2100_v1 = vpop.f32.mrb[27].mxu0 }
 0x6a3   : > { %v2101_v12 = vadd.f32 %v2100_v1, %v2099_v15 }
 0x6a5   : > { %v1688_v4 = vadd.f32 %v2101_v12, %v1937_v32  ;;  %v2102_v28 = vpop.f32.mrb[28].mxu0 }
 0x6a6   : > { %v2103_v40 = vpop.f32.mrb[29].mxu0 }
 0x6a7   : > { %v1793_v6 = vadd.f32 %v2212_v8, %v1688_v4  ;;  %v2104_v55 = vadd.f32 %v2103_v40, %v2102_v28 }
 0x6a9   : > { %v1811_v9 = vmax.f32 %v1793_v6, 0.0  ;;  %v1693_v37 = vadd.f32 %v2104_v55, %v1937_v32 }
 0x6aa   : > { %v2105_v44 = vpop.f32.mrb[30].mxu0 }
 0x6ab   : > { %1819 = vst.msk [vmem:[%s3619_s12 + $0x28] sm:$0xff] %vm477_vm2, %v1811_v9  ;;  %v1798_v54 = vadd.f32 %v1797_v47, %v1693_v37  ;;  %v2106_v2 = vpop.f32.mrb[31].mxu0 }
 0x6ac   : > { %v2107_v0 = vadd.f32 %v2106_v2, %v2105_v44 }
 0x6ad   : > { %v1812_v7 = vmax.f32 %v1798_v54, 0.0 }
 0x6ae   : > { %v1698_v30 = vadd.f32 %v2107_v0, %v1937_v32 }
 0x6af   : > { %1820 = vst.msk [vmem:[%s3619_s12 + $0x30] sm:$0xff] %vm477_vm2, %v1812_v7 }
 0x6b0   : > { %v1803_v17 = vadd.f32 %v2215_v13, %v1698_v30 }
 0x6b2   : > { %v1813_v19 = vmax.f32 %v1803_v17, 0.0 }
 0x6b4   : > { %1821 = vst.msk [vmem:[%s3619_s12 + $0x38] sm:$0xff] %vm477_vm2, %v1813_v19 }
 0x6b5   : > { %2707 = shalt.err (!%p2704_p3)
}
 0x6b6   : > { %s2708_s8 = scalar_lea.hbm %s3640_s16, 1024  ;;  %s2712_s15 = scalar_lea.hbm %s3694_s5, 2048 }
 0x6b7   : > { %p2709_p4 = scmp.ne.s32.totalorder %s3640_s16, %s2708_s8  ;;  %p2713_p9 = scmp.lt.u32.totalorder %s3640_s16, %s3694_s5 }
 0x6b8   : > { %p2714_p10 = scmp.lt.u32.totalorder %s2712_s15, %s2708_s8  ;;  %p2716_p12 = scmp.lt.u32.totalorder %s2708_s8, %s3640_s16 }
 0x6b9   : > { %p2710_p7 = pnand %p2709_p4, %p2833_p5 }
 0x6ba   : > { %p2715_p11 = por %p2714_p10, %p2713_p9 }
 0x6bb   : > { %p2711_p8 = pneg %p2710_p7 }
 0x6bc   : > { %p2717_p13 = por %p2716_p12, %p2715_p11 }
 0x6be   : > { %p2718_p0 = pnand %p2717_p13, %p2711_p8 }
 0x6c0   : > { %2721 = shalt.err (!%p2718_p0)
}
 0x6c1   : > { %s2763_s12 = smov 128   ;;  %s2764_s13 = smov 8  }
 0x6c2   : > { %2337 = dma.vmem_to_hbm [thread:$0]  (%p2833_p5), %s3642_s14, 1024, %s3640_s16, %s3648_s17, %s2763_s12, %s2763_s12, %s2764_s13  }
 0x6c3 PF: > { %p2343_p1 = scmp.ge.s32.totalorder %s2756_s21, 2  ;;  %s1851_s7 = sand.u32 1, %s2744_s18  }
 0x6c4   : > { %s1852_s10 = scalar_lea.sflag [#allocation4], %s1851_s7 }
 0x6c5   : > { %p2340_p2 = pnand %p2343_p1, %p2837_p6 }
 0x6c7   : > { %2739 = dma.done.wait (!%p2340_p2), %s1852_s10, 1024  }
 0x6c8   : > { %2741 = vsyncadd (!%p2340_p2), %s1852_s10, 4294966272  ;;  %p15_p3 = scmp.ge.s32.totalorder %s2820_s24, 4   ;;  %s3699_s18 = smov %s2748_s19 }
 0x6c9   : > { %s3700_s19 = smov %s2752_s20  ;;  %s3701_s20 = smov %s2831_s27 }
 0x6ca   : > { %s3702_s21 = smov %s2820_s24  ;;  %17 = sbr.rel (!%p15_p3) target bundleno = 3 (0x3), region = 76 }
 0x6d1   :  { %1857 = vsyncpa [#allocation4], 1 }
 0x6d2   :  { %1859 = vsyncpa [#allocation4 + $0x1], 1 }

</bundles_post_ra>
